<compile_context>
chip_gen: v6e
topology: v6e:2x2x1
jax: 0.10.0
libtpu: 0.0.40
codegen_flags: <defaults>
</compile_context>

<pallas_src>
import functools

import jax
import jax.numpy as jnp
import numpy as np
from jax.experimental import pallas as pl
from jax.experimental.pallas import tpu as pltpu


def _round_up(x, m):
    return ((x + m - 1) // m) * m


def _pick_tile(dim, pref, align):
    """Return (tile, padded_dim): full aligned extent if small, else `pref` chunks."""
    if dim <= pref:
        t = _round_up(dim, align)
        return t, t
    return pref, _round_up(dim, pref)


# ---------------------------------------------------------------------------
# Fused GEMM + bias (+ReLU) kernel: out[M, F] = act(A[M, K] @ B[K, F] + bias[F])
# ---------------------------------------------------------------------------
def _matmul_bias_act_kernel(a_ref, b_ref, bias_ref, o_ref, acc_ref, *, relu):
    k = pl.program_id(2)

    @pl.when(k == 0)
    def _():
        acc_ref[...] = jnp.zeros_like(acc_ref)

    acc_ref[...] += jnp.dot(a_ref[...], b_ref[...],
                            preferred_element_type=jnp.float32)

    # Epilogue: bias + ReLU fused on the resident f32 accumulator (VPU work hidden
    # under the MXU); runs once per output tile, so the bias broadcast is hoisted
    # out of the K loop by construction.
    @pl.when(k == pl.num_programs(2) - 1)
    def _():
        out = acc_ref[...] + bias_ref[...]          # (tm, tn) + (1, tn)
        if relu:
            out = jnp.maximum(out, 0.0)
        o_ref[...] = out.astype(o_ref.dtype)


def matmul_bias_act(a, w, b, *, relu):
    """act(a @ w + b) with lane-dense output (features padded to 128 on the lane axis)."""
    M, K = a.shape
    K2, F = w.shape
    assert K == K2 and b.shape == (F,)

    tm, m_pad = _pick_tile(M, 256, 8)      # sublane axis (multiple of 8)
    tk, k_pad = _pick_tile(K, 512, 128)    # reduction axis (multiple of 128)
    tn, n_pad = _pick_tile(F, 256, 128)    # lane axis (multiple of 128)

    a_p = jnp.pad(a.astype(jnp.float32), ((0, m_pad - M), (0, k_pad - K)))
    w_p = jnp.pad(w.astype(jnp.float32), ((0, k_pad - K), (0, n_pad - F)))
    b_p = jnp.pad(b.astype(jnp.float32), (0, n_pad - F)).reshape(1, n_pad)

    grid = (m_pad // tm, n_pad // tn, k_pad // tk)   # K last ("arbitrary")

    out = pl.pallas_call(
        functools.partial(_matmul_bias_act_kernel, relu=relu),
        out_shape=jax.ShapeDtypeStruct((m_pad, n_pad), jnp.float32),
        grid_spec=pltpu.PrefetchScalarGridSpec(
            num_scalar_prefetch=0,
            grid=grid,
            in_specs=[
                pl.BlockSpec((tm, tk), lambda i, j, k: (i, k)),
                pl.BlockSpec((tk, tn), lambda i, j, k: (k, j)),
                pl.BlockSpec((1, tn), lambda i, j, k: (0, j)),
            ],
            out_specs=pl.BlockSpec((tm, tn), lambda i, j, k: (i, j)),
            scratch_shapes=[pltpu.VMEM((tm, tn), jnp.float32)],
        ),
        compiler_params=pltpu.CompilerParams(
            dimension_semantics=("parallel", "parallel", "arbitrary")),
    )(a_p, w_p, b_p)
    return out[:M, :F]


# ---------------------------------------------------------------------------
# MaxPool2d(2, 2): lane-dense 4-way max over the (dy, dx) sub-sampled views
# ---------------------------------------------------------------------------
def _max4_kernel(a_ref, b_ref, c_ref, d_ref, o_ref):
    o_ref[...] = jnp.maximum(jnp.maximum(a_ref[...], b_ref[...]),
                             jnp.maximum(c_ref[...], d_ref[...]))


def maxpool2x2(x):
    """x: (N, H, W, C) float32 -> (N, H//2, W//2, C). PyTorch floor semantics."""
    n, h, w, c = x.shape
    ho, wo = h // 2, w // 2
    x = x[:, :ho * 2, :wo * 2, :]                 # drop odd trailing row/col
    v = x.reshape(n, ho, 2, wo, 2, c)
    m = n * ho * wo

    tm, m_pad = _pick_tile(m, 256, 8)
    tn, c_pad = _pick_tile(c, 256, 128)
    assert c_pad == tn

    views = []
    for dy in range(2):
        for dx in range(2):
            vv = v[:, :, dy, :, dx, :].reshape(m, c)
            views.append(jnp.pad(vv, ((0, m_pad - m), (0, c_pad - c))))

    spec = pl.BlockSpec((tm, tn), lambda i: (i, 0))
    out = pl.pallas_call(
        _max4_kernel,
        out_shape=jax.ShapeDtypeStruct((m_pad, c_pad), jnp.float32),
        grid_spec=pltpu.PrefetchScalarGridSpec(
            num_scalar_prefetch=0,
            grid=(m_pad // tm,),
            in_specs=[spec] * 4,
            out_specs=spec,
        ),
        compiler_params=pltpu.CompilerParams(dimension_semantics=("parallel",)),
    )(*views)
    return out[:m, :c].reshape(n, ho, wo, c)


# ---------------------------------------------------------------------------
# Layout glue + full forward pass
# ---------------------------------------------------------------------------
def _im2col(x, kh, kw):
    """x: (N, H, W, C) -> patches (N*Ho*Wo, kh*kw*C); patch order (dy, dx, c)."""
    n, h, w, c = x.shape
    ho, wo = h - kh + 1, w - kw + 1
    cols = [x[:, dy:dy + ho, dx:dx + wo, :] for dy in range(kh) for dx in range(kw)]
    patches = jnp.concatenate(cols, axis=-1)          # (N, Ho, Wo, kh*kw*C)
    return patches.reshape(n * ho * wo, kh * kw * c), (n, ho, wo)


def convnet_forward(params, x_nchw):
    """Forward pass of the PyTorch ConvNet.  Input NCHW (as PyTorch); compute in NHWC."""
    x = jnp.transpose(x_nchw, (0, 2, 3, 1)).astype(jnp.float32)   # -> NHWC

    # conv1 (3 -> 6, 5x5) + ReLU (fused in GEMM epilogue), then 2x2 max-pool.
    a, (n, ho, wo) = _im2col(x, 5, 5)
    y = matmul_bias_act(a, params["conv1_w"].reshape(-1, 6), params["conv1_b"], relu=True)
    y = maxpool2x2(y.reshape(n, ho, wo, 6))

    # conv2 (6 -> 16, 5x5) + ReLU, then 2x2 max-pool.
    a, (n, ho, wo) = _im2col(y, 5, 5)
    y = matmul_bias_act(a, params["conv2_w"].reshape(-1, 16), params["conv2_b"], relu=True)
    y = maxpool2x2(y.reshape(n, ho, wo, 16))

    # Flatten.  NHWC order; fc1 weights are defined on this order, so this is just a
    # re-parameterization of PyTorch's NCHW .view(-1, 16*5*5): same forward semantics.
    y = y.reshape(n, -1)                               # (N, 400)

    y = matmul_bias_act(y, params["fc1_w"], params["fc1_b"], relu=True)
    y = matmul_bias_act(y, params["fc2_w"], params["fc2_b"], relu=True)
    y = matmul_bias_act(y, params["fc3_w"], params["fc3_b"], relu=False)
    return y


def reference_forward(params, x_nchw):
    """Pure-JAX reference (lax.conv) for correctness checking."""
    hp = jax.lax.Precision.HIGHEST
    x = jnp.transpose(x_nchw, (0, 2, 3, 1)).astype(jnp.float32)

    def conv_relu(x, w, b):
        y = jax.lax.conv_general_dilated(
            x, w, window_strides=(1, 1), padding="VALID",
            dimension_numbers=("NHWC", "HWIO", "NHWC"), precision=hp)
        return jax.nn.relu(y + b)

    def pool(x):
        n, h, w, c = x.shape
        return x[:, :h // 2 * 2, :w // 2 * 2, :].reshape(
            n, h // 2, 2, w // 2, 2, c).max(axis=(2, 4))

    y = pool(conv_relu(x, params["conv1_w"], params["conv1_b"]))
    y = pool(conv_relu(y, params["conv2_w"], params["conv2_b"]))
    y = y.reshape(y.shape[0], -1)
    y = jax.nn.relu(jnp.dot(y, params["fc1_w"], precision=hp) + params["fc1_b"])
    y = jax.nn.relu(jnp.dot(y, params["fc2_w"], precision=hp) + params["fc2_b"])
    return jnp.dot(y, params["fc3_w"], precision=hp) + params["fc3_b"]


if __name__ == "__main__":
    key = jax.random.PRNGKey(0)
    kx, *kp = jax.random.split(key, 11)

    def init(k, shape, scale):
        return (scale * jax.random.normal(k, shape)).astype(jnp.float32)

    params = {
        "conv1_w": init(kp[0], (5, 5, 3, 6), 0.10),    # HWIO
        "conv1_b": init(kp[1], (6,), 0.10),
        "conv2_w": init(kp[2], (5, 5, 6, 16), 0.08),
        "conv2_b": init(kp[3], (16,), 0.08),
        "fc1_w": init(kp[4], (16 * 5 * 5, 120), 0.05),
        "fc1_b": init(kp[5], (120,), 0.05),
        "fc2_w": init(kp[6], (120, 84), 0.05),
        "fc2_b": init(kp[7], (84,), 0.05),
        "fc3_w": init(kp[8], (84, 10), 0.05),
        "fc3_b": init(kp[9], (10,), 0.05),
    }
    # Spatial size 32 is what the module's .view(-1, 16*5*5) implies (32->28->14->10->5).
    x = jax.random.normal(kx, (2, 3, 32, 32), dtype=jnp.float32)

    out = jax.jit(convnet_forward)(params, x)
    out = jax.block_until_ready(out)
    assert out.shape == (2, 10), out.shape

    ref = reference_forward(params, x)
    np.testing.assert_allclose(np.asarray(out), np.asarray(ref), rtol=2e-2, atol=2e-2)

    print("KERNEL_OK")
</pallas_src>

<mosaic_0001>
module attributes {stable_mosaic.version = 11 : i64} {
  func.func @_matmul_bias_act_kernel(%arg0: i32, %arg1: i32, %arg2: i32, %arg3: memref<256x128xf32, #tpu.memory_space<vmem>>, %arg4: memref<128x128xf32, #tpu.memory_space<vmem>>, %arg5: memref<1x128xf32, #tpu.memory_space<vmem>>, %arg6: memref<256x128xf32, #tpu.memory_space<vmem>>, %arg7: memref<256x128xf32, #tpu.memory_space<vmem>>) attributes {dimension_semantics = [#tpu.dimension_semantics<parallel>, #tpu.dimension_semantics<parallel>, #tpu.dimension_semantics<arbitrary>], iteration_bounds = array<i64: 7, 1, 1>, scalar_prefetch = 0 : i64, scratch_operands = 1 : i64, tpu.core_type = #tpu.core_type<tc>, window_params = [{transform_indices = @transform_0, window_bounds = array<i64: 256, 128>}, {transform_indices = @transform_1, window_bounds = array<i64: 128, 128>}, {transform_indices = @transform_2, window_bounds = array<i64: 1, 128>}, {transform_indices = @transform_3, window_bounds = array<i64: 256, 128>}]} {
    %c0_i32 = arith.constant 0 : i32
    %0 = arith.cmpi eq, %arg2, %c0_i32 : i32
    %1 = arith.extui %0 : i1 to i32
    %c0_i32_0 = arith.constant 0 : i32
    %2 = arith.cmpi ne, %1, %c0_i32_0 : i32
    scf.if %2 {
      %cst_10 = arith.constant 0.000000e+00 : f32
      %12 = vector.broadcast %cst_10 : f32 to vector<256x128xf32>
      %c0_11 = arith.constant 0 : index
      %c0_12 = arith.constant 0 : index
      %13 = vector.load %arg7[%c0_11, %c0_12] : memref<256x128xf32, #tpu.memory_space<vmem>>, vector<256x128xf32>
      tpu.vector_store %arg7[%c0_11, %c0_12], %12 {strides = array<i32>} : memref<256x128xf32, #tpu.memory_space<vmem>>, vector<256x128xf32>,
    } else {
    }
    %c0 = arith.constant 0 : index
    %c0_1 = arith.constant 0 : index
    %3 = vector.load %arg7[%c0, %c0_1] : memref<256x128xf32, #tpu.memory_space<vmem>>, vector<256x128xf32>
    %c0_2 = arith.constant 0 : index
    %c0_3 = arith.constant 0 : index
    %4 = vector.load %arg3[%c0_2, %c0_3] : memref<256x128xf32, #tpu.memory_space<vmem>>, vector<256x128xf32>
    %c0_4 = arith.constant 0 : index
    %c0_5 = arith.constant 0 : index
    %5 = vector.load %arg4[%c0_4, %c0_5] : memref<128x128xf32, #tpu.memory_space<vmem>>, vector<128x128xf32>
    %cst = arith.constant dense<0.000000e+00> : vector<256x128xf32>
    %6 = tpu.matmul %4, %5, %cst {dimension_numbers = #tpu.dot_dimension_numbers<[1], [0], [0], [1], [0, 0, 1, 1], [], []>} : vector<256x128xf32>, vector<128x128xf32>, vector<256x128xf32> -> vector<256x128xf32>
    %7 = arith.addf %3, %6 : vector<256x128xf32>
    %c0_6 = arith.constant 0 : index
    %c0_7 = arith.constant 0 : index
    %8 = vector.load %arg7[%c0_6, %c0_7] : memref<256x128xf32, #tpu.memory_space<vmem>>, vector<256x128xf32>
    tpu.vector_store %arg7[%c0_6, %c0_7], %7 {strides = array<i32>} : memref<256x128xf32, #tpu.memory_space<vmem>>, vector<256x128xf32>,
    %c0_i32_8 = arith.constant 0 : i32
    %9 = arith.cmpi eq, %arg2, %c0_i32_8 : i32
    %10 = arith.extui %9 : i1 to i32
    %c0_i32_9 = arith.constant 0 : i32
    %11 = arith.cmpi ne, %10, %c0_i32_9 : i32
    scf.if %11 {
      %c0_10 = arith.constant 0 : index
      %c0_11 = arith.constant 0 : index
      %12 = vector.load %arg7[%c0_10, %c0_11] : memref<256x128xf32, #tpu.memory_space<vmem>>, vector<256x128xf32>
      %c0_12 = arith.constant 0 : index
      %c0_13 = arith.constant 0 : index
      %13 = vector.load %arg5[%c0_12, %c0_13] : memref<1x128xf32, #tpu.memory_space<vmem>>, vector<1x128xf32>
      %14 = vector.broadcast %13 : vector<1x128xf32> to vector<256x128xf32>
      %15 = arith.addf %12, %14 : vector<256x128xf32>
      %cst_14 = arith.constant 0.000000e+00 : f32
      %16 = vector.broadcast %cst_14 : f32 to vector<256x128xf32>
      %17 = arith.maximumf %15, %16 : vector<256x128xf32>
      %c0_15 = arith.constant 0 : index
      %c0_16 = arith.constant 0 : index
      %18 = vector.load %arg6[%c0_15, %c0_16] : memref<256x128xf32, #tpu.memory_space<vmem>>, vector<256x128xf32>
      tpu.vector_store %arg6[%c0_15, %c0_16], %17 {strides = array<i32>} : memref<256x128xf32, #tpu.memory_space<vmem>>, vector<256x128xf32>,
    } else {
    }
    return
  }
  func.func @transform_0(%arg0: i32, %arg1: i32, %arg2: i32) -> (i32, i32) {
    %c0_i32 = arith.constant 0 : i32
    return %arg0, %arg2 : i32, i32
  }
  func.func @transform_1(%arg0: i32, %arg1: i32, %arg2: i32) -> (i32, i32) {
    %c0_i32 = arith.constant 0 : i32
    return %arg2, %arg1 : i32, i32
  }
  func.func @transform_2(%arg0: i32, %arg1: i32, %arg2: i32) -> (i32, i32) {
    %c0_i32 = arith.constant 0 : i32
    %c0_i32_0 = arith.constant 0 : i32
    return %c0_i32, %arg1 : i32, i32
  }
  func.func @transform_3(%arg0: i32, %arg1: i32, %arg2: i32) -> (i32, i32) {
    %c0_i32 = arith.constant 0 : i32
    return %arg0, %arg1 : i32, i32
  }
}

module attributes {stable_mosaic.version = 11 : i64} {
  func.func @_max4_kernel(%arg0: i32, %arg1: memref<256x128xf32, #tpu.memory_space<vmem>>, %arg2: memref<256x128xf32, #tpu.memory_space<vmem>>, %arg3: memref<256x128xf32, #tpu.memory_space<vmem>>, %arg4: memref<256x128xf32, #tpu.memory_space<vmem>>, %arg5: memref<256x128xf32, #tpu.memory_space<vmem>>) attributes {dimension_semantics = [#tpu.dimension_semantics<parallel>], iteration_bounds = array<i64: 2>, scalar_prefetch = 0 : i64, scratch_operands = 0 : i64, tpu.core_type = #tpu.core_type<tc>, window_params = [{transform_indices = @transform_0, window_bounds = array<i64: 256, 128>}, {transform_indices = @transform_1, window_bounds = array<i64: 256, 128>}, {transform_indices = @transform_2, window_bounds = array<i64: 256, 128>}, {transform_indices = @transform_3, window_bounds = array<i64: 256, 128>}, {transform_indices = @transform_4, window_bounds = array<i64: 256, 128>}]} {
    %c0 = arith.constant 0 : index
    %c0_0 = arith.constant 0 : index
    %0 = vector.load %arg1[%c0, %c0_0] : memref<256x128xf32, #tpu.memory_space<vmem>>, vector<256x128xf32>
    %c0_1 = arith.constant 0 : index
    %c0_2 = arith.constant 0 : index
    %1 = vector.load %arg2[%c0_1, %c0_2] : memref<256x128xf32, #tpu.memory_space<vmem>>, vector<256x128xf32>
    %2 = arith.maximumf %0, %1 : vector<256x128xf32>
    %c0_3 = arith.constant 0 : index
    %c0_4 = arith.constant 0 : index
    %3 = vector.load %arg3[%c0_3, %c0_4] : memref<256x128xf32, #tpu.memory_space<vmem>>, vector<256x128xf32>
    %c0_5 = arith.constant 0 : index
    %c0_6 = arith.constant 0 : index
    %4 = vector.load %arg4[%c0_5, %c0_6] : memref<256x128xf32, #tpu.memory_space<vmem>>, vector<256x128xf32>
    %5 = arith.maximumf %3, %4 : vector<256x128xf32>
    %6 = arith.maximumf %2, %5 : vector<256x128xf32>
    %c0_7 = arith.constant 0 : index
    %c0_8 = arith.constant 0 : index
    %7 = vector.load %arg5[%c0_7, %c0_8] : memref<256x128xf32, #tpu.memory_space<vmem>>, vector<256x128xf32>
    tpu.vector_store %arg5[%c0_7, %c0_8], %6 {strides = array<i32>} : memref<256x128xf32, #tpu.memory_space<vmem>>, vector<256x128xf32>,
    return
  }
  func.func @transform_0(%arg0: i32) -> (i32, i32) {
    %c0_i32 = arith.constant 0 : i32
    %c0_i32_0 = arith.constant 0 : i32
    return %arg0, %c0_i32 : i32, i32
  }
  func.func @transform_1(%arg0: i32) -> (i32, i32) {
    %c0_i32 = arith.constant 0 : i32
    %c0_i32_0 = arith.constant 0 : i32
    return %arg0, %c0_i32 : i32, i32
  }
  func.func @transform_2(%arg0: i32) -> (i32, i32) {
    %c0_i32 = arith.constant 0 : i32
    %c0_i32_0 = arith.constant 0 : i32
    return %arg0, %c0_i32 : i32, i32
  }
  func.func @transform_3(%arg0: i32) -> (i32, i32) {
    %c0_i32 = arith.constant 0 : i32
    %c0_i32_0 = arith.constant 0 : i32
    return %arg0, %c0_i32 : i32, i32
  }
  func.func @transform_4(%arg0: i32) -> (i32, i32) {
    %c0_i32 = arith.constant 0 : i32
    %c0_i32_0 = arith.constant 0 : i32
    return %arg0, %c0_i32 : i32, i32
  }
}

module attributes {stable_mosaic.version = 11 : i64} {
  func.func @_matmul_bias_act_kernel(%arg0: i32, %arg1: i32, %arg2: i32, %arg3: memref<200x256xf32, #tpu.memory_space<vmem>>, %arg4: memref<256x128xf32, #tpu.memory_space<vmem>>, %arg5: memref<1x128xf32, #tpu.memory_space<vmem>>, %arg6: memref<200x128xf32, #tpu.memory_space<vmem>>, %arg7: memref<200x128xf32, #tpu.memory_space<vmem>>) attributes {dimension_semantics = [#tpu.dimension_semantics<parallel>, #tpu.dimension_semantics<parallel>, #tpu.dimension_semantics<arbitrary>], iteration_bounds = array<i64: 1, 1, 1>, scalar_prefetch = 0 : i64, scratch_operands = 1 : i64, tpu.core_type = #tpu.core_type<tc>, window_params = [{transform_indices = @transform_0, window_bounds = array<i64: 200, 256>}, {transform_indices = @transform_1, window_bounds = array<i64: 256, 128>}, {transform_indices = @transform_2, window_bounds = array<i64: 1, 128>}, {transform_indices = @transform_3, window_bounds = array<i64: 200, 128>}]} {
    %c0_i32 = arith.constant 0 : i32
    %0 = arith.cmpi eq, %arg2, %c0_i32 : i32
    %1 = arith.extui %0 : i1 to i32
    %c0_i32_0 = arith.constant 0 : i32
    %2 = arith.cmpi ne, %1, %c0_i32_0 : i32
    scf.if %2 {
      %cst_10 = arith.constant 0.000000e+00 : f32
      %12 = vector.broadcast %cst_10 : f32 to vector<200x128xf32>
      %c0_11 = arith.constant 0 : index
      %c0_12 = arith.constant 0 : index
      %13 = vector.load %arg7[%c0_11, %c0_12] : memref<200x128xf32, #tpu.memory_space<vmem>>, vector<200x128xf32>
      tpu.vector_store %arg7[%c0_11, %c0_12], %12 {strides = array<i32>} : memref<200x128xf32, #tpu.memory_space<vmem>>, vector<200x128xf32>,
    } else {
    }
    %c0 = arith.constant 0 : index
    %c0_1 = arith.constant 0 : index
    %3 = vector.load %arg7[%c0, %c0_1] : memref<200x128xf32, #tpu.memory_space<vmem>>, vector<200x128xf32>
    %c0_2 = arith.constant 0 : index
    %c0_3 = arith.constant 0 : index
    %4 = vector.load %arg3[%c0_2, %c0_3] : memref<200x256xf32, #tpu.memory_space<vmem>>, vector<200x256xf32>
    %c0_4 = arith.constant 0 : index
    %c0_5 = arith.constant 0 : index
    %5 = vector.load %arg4[%c0_4, %c0_5] : memref<256x128xf32, #tpu.memory_space<vmem>>, vector<256x128xf32>
    %cst = arith.constant dense<0.000000e+00> : vector<200x128xf32>
    %6 = tpu.matmul %4, %5, %cst {dimension_numbers = #tpu.dot_dimension_numbers<[1], [0], [0], [1], [0, 0, 1, 1], [], []>} : vector<200x256xf32>, vector<256x128xf32>, vector<200x128xf32> -> vector<200x128xf32>
    %7 = arith.addf %3, %6 : vector<200x128xf32>
    %c0_6 = arith.constant 0 : index
    %c0_7 = arith.constant 0 : index
    %8 = vector.load %arg7[%c0_6, %c0_7] : memref<200x128xf32, #tpu.memory_space<vmem>>, vector<200x128xf32>
    tpu.vector_store %arg7[%c0_6, %c0_7], %7 {strides = array<i32>} : memref<200x128xf32, #tpu.memory_space<vmem>>, vector<200x128xf32>,
    %c0_i32_8 = arith.constant 0 : i32
    %9 = arith.cmpi eq, %arg2, %c0_i32_8 : i32
    %10 = arith.extui %9 : i1 to i32
    %c0_i32_9 = arith.constant 0 : i32
    %11 = arith.cmpi ne, %10, %c0_i32_9 : i32
    scf.if %11 {
      %c0_10 = arith.constant 0 : index
      %c0_11 = arith.constant 0 : index
      %12 = vector.load %arg7[%c0_10, %c0_11] : memref<200x128xf32, #tpu.memory_space<vmem>>, vector<200x128xf32>
      %c0_12 = arith.constant 0 : index
      %c0_13 = arith.constant 0 : index
      %13 = vector.load %arg5[%c0_12, %c0_13] : memref<1x128xf32, #tpu.memory_space<vmem>>, vector<1x128xf32>
      %14 = vector.broadcast %13 : vector<1x128xf32> to vector<200x128xf32>
      %15 = arith.addf %12, %14 : vector<200x128xf32>
      %cst_14 = arith.constant 0.000000e+00 : f32
      %16 = vector.broadcast %cst_14 : f32 to vector<200x128xf32>
      %17 = arith.maximumf %15, %16 : vector<200x128xf32>
      %c0_15 = arith.constant 0 : index
      %c0_16 = arith.constant 0 : index
      %18 = vector.load %arg6[%c0_15, %c0_16] : memref<200x128xf32, #tpu.memory_space<vmem>>, vector<200x128xf32>
      tpu.vector_store %arg6[%c0_15, %c0_16], %17 {strides = array<i32>} : memref<200x128xf32, #tpu.memory_space<vmem>>, vector<200x128xf32>,
    } else {
    }
    return
  }
  func.func @transform_0(%arg0: i32, %arg1: i32, %arg2: i32) -> (i32, i32) {
    %c0_i32 = arith.constant 0 : i32
    return %arg0, %arg2 : i32, i32
  }
  func.func @transform_1(%arg0: i32, %arg1: i32, %arg2: i32) -> (i32, i32) {
    %c0_i32 = arith.constant 0 : i32
    return %arg2, %arg1 : i32, i32
  }
  func.func @transform_2(%arg0: i32, %arg1: i32, %arg2: i32) -> (i32, i32) {
    %c0_i32 = arith.constant 0 : i32
    %c0_i32_0 = arith.constant 0 : i32
    return %c0_i32, %arg1 : i32, i32
  }
  func.func @transform_3(%arg0: i32, %arg1: i32, %arg2: i32) -> (i32, i32) {
    %c0_i32 = arith.constant 0 : i32
    return %arg0, %arg1 : i32, i32
  }
}

module attributes {stable_mosaic.version = 11 : i64} {
  func.func @_max4_kernel(%arg0: i32, %arg1: memref<56x128xf32, #tpu.memory_space<vmem>>, %arg2: memref<56x128xf32, #tpu.memory_space<vmem>>, %arg3: memref<56x128xf32, #tpu.memory_space<vmem>>, %arg4: memref<56x128xf32, #tpu.memory_space<vmem>>, %arg5: memref<56x128xf32, #tpu.memory_space<vmem>>) attributes {dimension_semantics = [#tpu.dimension_semantics<parallel>], iteration_bounds = array<i64: 1>, scalar_prefetch = 0 : i64, scratch_operands = 0 : i64, tpu.core_type = #tpu.core_type<tc>, window_params = [{transform_indices = @transform_0, window_bounds = array<i64: 56, 128>}, {transform_indices = @transform_1, window_bounds = array<i64: 56, 128>}, {transform_indices = @transform_2, window_bounds = array<i64: 56, 128>}, {transform_indices = @transform_3, window_bounds = array<i64: 56, 128>}, {transform_indices = @transform_4, window_bounds = array<i64: 56, 128>}]} {
    %c0 = arith.constant 0 : index
    %c0_0 = arith.constant 0 : index
    %0 = vector.load %arg1[%c0, %c0_0] : memref<56x128xf32, #tpu.memory_space<vmem>>, vector<56x128xf32>
    %c0_1 = arith.constant 0 : index
    %c0_2 = arith.constant 0 : index
    %1 = vector.load %arg2[%c0_1, %c0_2] : memref<56x128xf32, #tpu.memory_space<vmem>>, vector<56x128xf32>
    %2 = arith.maximumf %0, %1 : vector<56x128xf32>
    %c0_3 = arith.constant 0 : index
    %c0_4 = arith.constant 0 : index
    %3 = vector.load %arg3[%c0_3, %c0_4] : memref<56x128xf32, #tpu.memory_space<vmem>>, vector<56x128xf32>
    %c0_5 = arith.constant 0 : index
    %c0_6 = arith.constant 0 : index
    %4 = vector.load %arg4[%c0_5, %c0_6] : memref<56x128xf32, #tpu.memory_space<vmem>>, vector<56x128xf32>
    %5 = arith.maximumf %3, %4 : vector<56x128xf32>
    %6 = arith.maximumf %2, %5 : vector<56x128xf32>
    %c0_7 = arith.constant 0 : index
    %c0_8 = arith.constant 0 : index
    %7 = vector.load %arg5[%c0_7, %c0_8] : memref<56x128xf32, #tpu.memory_space<vmem>>, vector<56x128xf32>
    tpu.vector_store %arg5[%c0_7, %c0_8], %6 {strides = array<i32>} : memref<56x128xf32, #tpu.memory_space<vmem>>, vector<56x128xf32>,
    return
  }
  func.func @transform_0(%arg0: i32) -> (i32, i32) {
    %c0_i32 = arith.constant 0 : i32
    %c0_i32_0 = arith.constant 0 : i32
    return %arg0, %c0_i32 : i32, i32
  }
  func.func @transform_1(%arg0: i32) -> (i32, i32) {
    %c0_i32 = arith.constant 0 : i32
    %c0_i32_0 = arith.constant 0 : i32
    return %arg0, %c0_i32 : i32, i32
  }
  func.func @transform_2(%arg0: i32) -> (i32, i32) {
    %c0_i32 = arith.constant 0 : i32
    %c0_i32_0 = arith.constant 0 : i32
    return %arg0, %c0_i32 : i32, i32
  }
  func.func @transform_3(%arg0: i32) -> (i32, i32) {
    %c0_i32 = arith.constant 0 : i32
    %c0_i32_0 = arith.constant 0 : i32
    return %arg0, %c0_i32 : i32, i32
  }
  func.func @transform_4(%arg0: i32) -> (i32, i32) {
    %c0_i32 = arith.constant 0 : i32
    %c0_i32_0 = arith.constant 0 : i32
    return %arg0, %c0_i32 : i32, i32
  }
}

module attributes {stable_mosaic.version = 11 : i64} {
  func.func @_matmul_bias_act_kernel(%arg0: i32, %arg1: i32, %arg2: i32, %arg3: memref<8x512xf32, #tpu.memory_space<vmem>>, %arg4: memref<512x128xf32, #tpu.memory_space<vmem>>, %arg5: memref<1x128xf32, #tpu.memory_space<vmem>>, %arg6: memref<8x128xf32, #tpu.memory_space<vmem>>, %arg7: memref<8x128xf32, #tpu.memory_space<vmem>>) attributes {dimension_semantics = [#tpu.dimension_semantics<parallel>, #tpu.dimension_semantics<parallel>, #tpu.dimension_semantics<arbitrary>], iteration_bounds = array<i64: 1, 1, 1>, scalar_prefetch = 0 : i64, scratch_operands = 1 : i64, tpu.core_type = #tpu.core_type<tc>, window_params = [{transform_indices = @transform_0, window_bounds = array<i64: 8, 512>}, {transform_indices = @transform_1, window_bounds = array<i64: 512, 128>}, {transform_indices = @transform_2, window_bounds = array<i64: 1, 128>}, {transform_indices = @transform_3, window_bounds = array<i64: 8, 128>}]} {
    %c0_i32 = arith.constant 0 : i32
    %0 = arith.cmpi eq, %arg2, %c0_i32 : i32
    %1 = arith.extui %0 : i1 to i32
    %c0_i32_0 = arith.constant 0 : i32
    %2 = arith.cmpi ne, %1, %c0_i32_0 : i32
    scf.if %2 {
      %cst_10 = arith.constant 0.000000e+00 : f32
      %12 = vector.broadcast %cst_10 : f32 to vector<8x128xf32>
      %c0_11 = arith.constant 0 : index
      %c0_12 = arith.constant 0 : index
      %13 = vector.load %arg7[%c0_11, %c0_12] : memref<8x128xf32, #tpu.memory_space<vmem>>, vector<8x128xf32>
      tpu.vector_store %arg7[%c0_11, %c0_12], %12 {strides = array<i32>} : memref<8x128xf32, #tpu.memory_space<vmem>>, vector<8x128xf32>,
    } else {
    }
    %c0 = arith.constant 0 : index
    %c0_1 = arith.constant 0 : index
    %3 = vector.load %arg7[%c0, %c0_1] : memref<8x128xf32, #tpu.memory_space<vmem>>, vector<8x128xf32>
    %c0_2 = arith.constant 0 : index
    %c0_3 = arith.constant 0 : index
    %4 = vector.load %arg3[%c0_2, %c0_3] : memref<8x512xf32, #tpu.memory_space<vmem>>, vector<8x512xf32>
    %c0_4 = arith.constant 0 : index
    %c0_5 = arith.constant 0 : index
    %5 = vector.load %arg4[%c0_4, %c0_5] : memref<512x128xf32, #tpu.memory_space<vmem>>, vector<512x128xf32>
    %cst = arith.constant dense<0.000000e+00> : vector<8x128xf32>
    %6 = tpu.matmul %4, %5, %cst {dimension_numbers = #tpu.dot_dimension_numbers<[1], [0], [0], [1], [0, 0, 1, 1], [], []>} : vector<8x512xf32>, vector<512x128xf32>, vector<8x128xf32> -> vector<8x128xf32>
    %7 = arith.addf %3, %6 : vector<8x128xf32>
    %c0_6 = arith.constant 0 : index
    %c0_7 = arith.constant 0 : index
    %8 = vector.load %arg7[%c0_6, %c0_7] : memref<8x128xf32, #tpu.memory_space<vmem>>, vector<8x128xf32>
    tpu.vector_store %arg7[%c0_6, %c0_7], %7 {strides = array<i32>} : memref<8x128xf32, #tpu.memory_space<vmem>>, vector<8x128xf32>,
    %c0_i32_8 = arith.constant 0 : i32
    %9 = arith.cmpi eq, %arg2, %c0_i32_8 : i32
    %10 = arith.extui %9 : i1 to i32
    %c0_i32_9 = arith.constant 0 : i32
    %11 = arith.cmpi ne, %10, %c0_i32_9 : i32
    scf.if %11 {
      %c0_10 = arith.constant 0 : index
      %c0_11 = arith.constant 0 : index
      %12 = vector.load %arg7[%c0_10, %c0_11] : memref<8x128xf32, #tpu.memory_space<vmem>>, vector<8x128xf32>
      %c0_12 = arith.constant 0 : index
      %c0_13 = arith.constant 0 : index
      %13 = vector.load %arg5[%c0_12, %c0_13] : memref<1x128xf32, #tpu.memory_space<vmem>>, vector<1x128xf32>
      %14 = vector.broadcast %13 : vector<1x128xf32> to vector<8x128xf32>
      %15 = arith.addf %12, %14 : vector<8x128xf32>
      %cst_14 = arith.constant 0.000000e+00 : f32
      %16 = vector.broadcast %cst_14 : f32 to vector<8x128xf32>
      %17 = arith.maximumf %15, %16 : vector<8x128xf32>
      %c0_15 = arith.constant 0 : index
      %c0_16 = arith.constant 0 : index
      %18 = vector.load %arg6[%c0_15, %c0_16] : memref<8x128xf32, #tpu.memory_space<vmem>>, vector<8x128xf32>
      tpu.vector_store %arg6[%c0_15, %c0_16], %17 {strides = array<i32>} : memref<8x128xf32, #tpu.memory_space<vmem>>, vector<8x128xf32>,
    } else {
    }
    return
  }
  func.func @transform_0(%arg0: i32, %arg1: i32, %arg2: i32) -> (i32, i32) {
    %c0_i32 = arith.constant 0 : i32
    return %arg0, %arg2 : i32, i32
  }
  func.func @transform_1(%arg0: i32, %arg1: i32, %arg2: i32) -> (i32, i32) {
    %c0_i32 = arith.constant 0 : i32
    return %arg2, %arg1 : i32, i32
  }
  func.func @transform_2(%arg0: i32, %arg1: i32, %arg2: i32) -> (i32, i32) {
    %c0_i32 = arith.constant 0 : i32
    %c0_i32_0 = arith.constant 0 : i32
    return %c0_i32, %arg1 : i32, i32
  }
  func.func @transform_3(%arg0: i32, %arg1: i32, %arg2: i32) -> (i32, i32) {
    %c0_i32 = arith.constant 0 : i32
    return %arg0, %arg1 : i32, i32
  }
}

module attributes {stable_mosaic.version = 11 : i64} {
  func.func @_matmul_bias_act_kernel(%arg0: i32, %arg1: i32, %arg2: i32, %arg3: memref<8x128xf32, #tpu.memory_space<vmem>>, %arg4: memref<128x128xf32, #tpu.memory_space<vmem>>, %arg5: memref<1x128xf32, #tpu.memory_space<vmem>>, %arg6: memref<8x128xf32, #tpu.memory_space<vmem>>, %arg7: memref<8x128xf32, #tpu.memory_space<vmem>>) attributes {dimension_semantics = [#tpu.dimension_semantics<parallel>, #tpu.dimension_semantics<parallel>, #tpu.dimension_semantics<arbitrary>], iteration_bounds = array<i64: 1, 1, 1>, scalar_prefetch = 0 : i64, scratch_operands = 1 : i64, tpu.core_type = #tpu.core_type<tc>, window_params = [{transform_indices = @transform_0, window_bounds = array<i64: 8, 128>}, {transform_indices = @transform_1, window_bounds = array<i64: 128, 128>}, {transform_indices = @transform_2, window_bounds = array<i64: 1, 128>}, {transform_indices = @transform_3, window_bounds = array<i64: 8, 128>}]} {
    %c0_i32 = arith.constant 0 : i32
    %0 = arith.cmpi eq, %arg2, %c0_i32 : i32
    %1 = arith.extui %0 : i1 to i32
    %c0_i32_0 = arith.constant 0 : i32
    %2 = arith.cmpi ne, %1, %c0_i32_0 : i32
    scf.if %2 {
      %cst_10 = arith.constant 0.000000e+00 : f32
      %12 = vector.broadcast %cst_10 : f32 to vector<8x128xf32>
      %c0_11 = arith.constant 0 : index
      %c0_12 = arith.constant 0 : index
      %13 = vector.load %arg7[%c0_11, %c0_12] : memref<8x128xf32, #tpu.memory_space<vmem>>, vector<8x128xf32>
      tpu.vector_store %arg7[%c0_11, %c0_12], %12 {strides = array<i32>} : memref<8x128xf32, #tpu.memory_space<vmem>>, vector<8x128xf32>,
    } else {
    }
    %c0 = arith.constant 0 : index
    %c0_1 = arith.constant 0 : index
    %3 = vector.load %arg7[%c0, %c0_1] : memref<8x128xf32, #tpu.memory_space<vmem>>, vector<8x128xf32>
    %c0_2 = arith.constant 0 : index
    %c0_3 = arith.constant 0 : index
    %4 = vector.load %arg3[%c0_2, %c0_3] : memref<8x128xf32, #tpu.memory_space<vmem>>, vector<8x128xf32>
    %c0_4 = arith.constant 0 : index
    %c0_5 = arith.constant 0 : index
    %5 = vector.load %arg4[%c0_4, %c0_5] : memref<128x128xf32, #tpu.memory_space<vmem>>, vector<128x128xf32>
    %cst = arith.constant dense<0.000000e+00> : vector<8x128xf32>
    %6 = tpu.matmul %4, %5, %cst {dimension_numbers = #tpu.dot_dimension_numbers<[1], [0], [0], [1], [0, 0, 1, 1], [], []>} : vector<8x128xf32>, vector<128x128xf32>, vector<8x128xf32> -> vector<8x128xf32>
    %7 = arith.addf %3, %6 : vector<8x128xf32>
    %c0_6 = arith.constant 0 : index
    %c0_7 = arith.constant 0 : index
    %8 = vector.load %arg7[%c0_6, %c0_7] : memref<8x128xf32, #tpu.memory_space<vmem>>, vector<8x128xf32>
    tpu.vector_store %arg7[%c0_6, %c0_7], %7 {strides = array<i32>} : memref<8x128xf32, #tpu.memory_space<vmem>>, vector<8x128xf32>,
    %c0_i32_8 = arith.constant 0 : i32
    %9 = arith.cmpi eq, %arg2, %c0_i32_8 : i32
    %10 = arith.extui %9 : i1 to i32
    %c0_i32_9 = arith.constant 0 : i32
    %11 = arith.cmpi ne, %10, %c0_i32_9 : i32
    scf.if %11 {
      %c0_10 = arith.constant 0 : index
      %c0_11 = arith.constant 0 : index
      %12 = vector.load %arg7[%c0_10, %c0_11] : memref<8x128xf32, #tpu.memory_space<vmem>>, vector<8x128xf32>
      %c0_12 = arith.constant 0 : index
      %c0_13 = arith.constant 0 : index
      %13 = vector.load %arg5[%c0_12, %c0_13] : memref<1x128xf32, #tpu.memory_space<vmem>>, vector<1x128xf32>
      %14 = vector.broadcast %13 : vector<1x128xf32> to vector<8x128xf32>
      %15 = arith.addf %12, %14 : vector<8x128xf32>
      %cst_14 = arith.constant 0.000000e+00 : f32
      %16 = vector.broadcast %cst_14 : f32 to vector<8x128xf32>
      %17 = arith.maximumf %15, %16 : vector<8x128xf32>
      %c0_15 = arith.constant 0 : index
      %c0_16 = arith.constant 0 : index
      %18 = vector.load %arg6[%c0_15, %c0_16] : memref<8x128xf32, #tpu.memory_space<vmem>>, vector<8x128xf32>
      tpu.vector_store %arg6[%c0_15, %c0_16], %17 {strides = array<i32>} : memref<8x128xf32, #tpu.memory_space<vmem>>, vector<8x128xf32>,
    } else {
    }
    return
  }
  func.func @transform_0(%arg0: i32, %arg1: i32, %arg2: i32) -> (i32, i32) {
    %c0_i32 = arith.constant 0 : i32
    return %arg0, %arg2 : i32, i32
  }
  func.func @transform_1(%arg0: i32, %arg1: i32, %arg2: i32) -> (i32, i32) {
    %c0_i32 = arith.constant 0 : i32
    return %arg2, %arg1 : i32, i32
  }
  func.func @transform_2(%arg0: i32, %arg1: i32, %arg2: i32) -> (i32, i32) {
    %c0_i32 = arith.constant 0 : i32
    %c0_i32_0 = arith.constant 0 : i32
    return %c0_i32, %arg1 : i32, i32
  }
  func.func @transform_3(%arg0: i32, %arg1: i32, %arg2: i32) -> (i32, i32) {
    %c0_i32 = arith.constant 0 : i32
    return %arg0, %arg1 : i32, i32
  }
}

module attributes {stable_mosaic.version = 11 : i64} {
  func.func @_matmul_bias_act_kernel(%arg0: i32, %arg1: i32, %arg2: i32, %arg3: memref<8x128xf32, #tpu.memory_space<vmem>>, %arg4: memref<128x128xf32, #tpu.memory_space<vmem>>, %arg5: memref<1x128xf32, #tpu.memory_space<vmem>>, %arg6: memref<8x128xf32, #tpu.memory_space<vmem>>, %arg7: memref<8x128xf32, #tpu.memory_space<vmem>>) attributes {dimension_semantics = [#tpu.dimension_semantics<parallel>, #tpu.dimension_semantics<parallel>, #tpu.dimension_semantics<arbitrary>], iteration_bounds = array<i64: 1, 1, 1>, scalar_prefetch = 0 : i64, scratch_operands = 1 : i64, tpu.core_type = #tpu.core_type<tc>, window_params = [{transform_indices = @transform_0, window_bounds = array<i64: 8, 128>}, {transform_indices = @transform_1, window_bounds = array<i64: 128, 128>}, {transform_indices = @transform_2, window_bounds = array<i64: 1, 128>}, {transform_indices = @transform_3, window_bounds = array<i64: 8, 128>}]} {
    %c0_i32 = arith.constant 0 : i32
    %0 = arith.cmpi eq, %arg2, %c0_i32 : i32
    %1 = arith.extui %0 : i1 to i32
    %c0_i32_0 = arith.constant 0 : i32
    %2 = arith.cmpi ne, %1, %c0_i32_0 : i32
    scf.if %2 {
      %cst_10 = arith.constant 0.000000e+00 : f32
      %12 = vector.broadcast %cst_10 : f32 to vector<8x128xf32>
      %c0_11 = arith.constant 0 : index
      %c0_12 = arith.constant 0 : index
      %13 = vector.load %arg7[%c0_11, %c0_12] : memref<8x128xf32, #tpu.memory_space<vmem>>, vector<8x128xf32>
      tpu.vector_store %arg7[%c0_11, %c0_12], %12 {strides = array<i32>} : memref<8x128xf32, #tpu.memory_space<vmem>>, vector<8x128xf32>,
    } else {
    }
    %c0 = arith.constant 0 : index
    %c0_1 = arith.constant 0 : index
    %3 = vector.load %arg7[%c0, %c0_1] : memref<8x128xf32, #tpu.memory_space<vmem>>, vector<8x128xf32>
    %c0_2 = arith.constant 0 : index
    %c0_3 = arith.constant 0 : index
    %4 = vector.load %arg3[%c0_2, %c0_3] : memref<8x128xf32, #tpu.memory_space<vmem>>, vector<8x128xf32>
    %c0_4 = arith.constant 0 : index
    %c0_5 = arith.constant 0 : index
    %5 = vector.load %arg4[%c0_4, %c0_5] : memref<128x128xf32, #tpu.memory_space<vmem>>, vector<128x128xf32>
    %cst = arith.constant dense<0.000000e+00> : vector<8x128xf32>
    %6 = tpu.matmul %4, %5, %cst {dimension_numbers = #tpu.dot_dimension_numbers<[1], [0], [0], [1], [0, 0, 1, 1], [], []>} : vector<8x128xf32>, vector<128x128xf32>, vector<8x128xf32> -> vector<8x128xf32>
    %7 = arith.addf %3, %6 : vector<8x128xf32>
    %c0_6 = arith.constant 0 : index
    %c0_7 = arith.constant 0 : index
    %8 = vector.load %arg7[%c0_6, %c0_7] : memref<8x128xf32, #tpu.memory_space<vmem>>, vector<8x128xf32>
    tpu.vector_store %arg7[%c0_6, %c0_7], %7 {strides = array<i32>} : memref<8x128xf32, #tpu.memory_space<vmem>>, vector<8x128xf32>,
    %c0_i32_8 = arith.constant 0 : i32
    %9 = arith.cmpi eq, %arg2, %c0_i32_8 : i32
    %10 = arith.extui %9 : i1 to i32
    %c0_i32_9 = arith.constant 0 : i32
    %11 = arith.cmpi ne, %10, %c0_i32_9 : i32
    scf.if %11 {
      %c0_10 = arith.constant 0 : index
      %c0_11 = arith.constant 0 : index
      %12 = vector.load %arg7[%c0_10, %c0_11] : memref<8x128xf32, #tpu.memory_space<vmem>>, vector<8x128xf32>
      %c0_12 = arith.constant 0 : index
      %c0_13 = arith.constant 0 : index
      %13 = vector.load %arg5[%c0_12, %c0_13] : memref<1x128xf32, #tpu.memory_space<vmem>>, vector<1x128xf32>
      %14 = vector.broadcast %13 : vector<1x128xf32> to vector<8x128xf32>
      %15 = arith.addf %12, %14 : vector<8x128xf32>
      %c0_14 = arith.constant 0 : index
      %c0_15 = arith.constant 0 : index
      %16 = vector.load %arg6[%c0_14, %c0_15] : memref<8x128xf32, #tpu.memory_space<vmem>>, vector<8x128xf32>
      tpu.vector_store %arg6[%c0_14, %c0_15], %15 {strides = array<i32>} : memref<8x128xf32, #tpu.memory_space<vmem>>, vector<8x128xf32>,
    } else {
    }
    return
  }
  func.func @transform_0(%arg0: i32, %arg1: i32, %arg2: i32) -> (i32, i32) {
    %c0_i32 = arith.constant 0 : i32
    return %arg0, %arg2 : i32, i32
  }
  func.func @transform_1(%arg0: i32, %arg1: i32, %arg2: i32) -> (i32, i32) {
    %c0_i32 = arith.constant 0 : i32
    return %arg2, %arg1 : i32, i32
  }
  func.func @transform_2(%arg0: i32, %arg1: i32, %arg2: i32) -> (i32, i32) {
    %c0_i32 = arith.constant 0 : i32
    %c0_i32_0 = arith.constant 0 : i32
    return %c0_i32, %arg1 : i32, i32
  }
  func.func @transform_3(%arg0: i32, %arg1: i32, %arg2: i32) -> (i32, i32) {
    %c0_i32 = arith.constant 0 : i32
    return %arg0, %arg1 : i32, i32
  }
}

</mosaic_0001>

<bundles_post_ra>
// kernel: convnet_forward.7
= control target key start
LH: loop header
LB: loop body
LE: loop exit
PB: predicated region body
PF: predicated region fallthrough
CT: control target
= control target key end

     0   :  { %s1155_s12 = smov 0   ;;  %s1157_s13 = smov 0   ;;  %s1351_s0 = inlined_call_operand.vmem [shape: f32[1792,128], index: 0, kind: input, shape index: {}]   ;;  %s1352_s1 = inlined_call_operand.vmem [shape: f32[128,128], index: 1, kind: input, shape index: {}]   ;;  %s1353_s2 = inlined_call_operand.vmem [shape: f32[1,128], index: 2, kind: input, shape index: {}]   ;;  %s1354_s3 = inlined_call_operand.vmem [shape: f32[1792,128], index: 3, kind: output, shape index: {}]  }
   0x1   :  { %s1159_s14 = smov 0  }
   0x2 LB: > { %s32_s15 = sadd.s32 1, %s1129_s13  ;;  %p919_p0 = scmp.ge.s32.totalorder %s1133_s14, 1  ;;  %s1133_s14 = sphi %s1159_s14, %s13_s14   ;;  %s1129_s13 = sphi %s1157_s13, %s1356_s13   ;;  %s1125_s12 = sphi %s1155_s12, %s1355_s12  }
   0x3   : > { %p34_p1 = scmp.ge.s32.totalorder %s32_s15, 7  ;;  %p188_p2 = scmp.lt.s32.totalorder %s1133_s14, 8 }
   0x5   : > { %s1358_s15 = smov (%p34_p1, %s32_s15), 0  ;;  %p189_p3 = pnand %p919_p0, %p188_p2 }
   0x6   : > { %s920_s5 = sshll.u32 (!%p189_p3), %s1125_s12, 5 }
   0x7   : > { %192 = sbr.rel (%p189_p3) target bundleno = 274 (0x112), region = 32  ;;  %p230_p4 = scmp.lt.s32.totalorder (!%p189_p3), %s920_s5, 223 }
   0xc   : > { %v374_v0 = vld [vmem:[%s1352_s1 + $0x78] sm:$0xff]  ;;  %v373_v1 = vld [vmem:[%s1352_s1 + $0x70] sm:$0xff]  ;;  %v372_v2 = vld [vmem:[%s1352_s1 + $0x68] sm:$0xff]  ;;  %s1360_s5 = smov (!%p230_p4, %s920_s5), 223 }
   0xd   : > { %975 = vmatprep.subr.mxu0 %v374_v0  ;;  %1055 = vmatprep.subr.mxu1 %v374_v0  ;;  %v371_v3 = vld [vmem:[%s1352_s1 + $0x60] sm:$0xff]  ;;  %v370_v4 = vld [vmem:[%s1352_s1 + $0x58] sm:$0xff]  ;;  %v369_v5 = vld [vmem:[%s1352_s1 + $0x50] sm:$0xff]  ;;  %s921_s21 = sshll.u32 %s1360_s5, 3 }
   0xe   : > { %976 = vmatpush3.msra.mxu0 %v374_v0  ;;  %1071 = vmatpush3.msra.mxu1 %v374_v0  ;;  %v368_v6 = vld [vmem:[%s1352_s1 + $0x48] sm:$0xff]  ;;  %v367_v7 = vld [vmem:[%s1352_s1 + $0x40] sm:$0xff]  ;;  %v366_v8 = vld [vmem:[%s1352_s1 + $0x38] sm:$0xff]  ;;  %s1229_s26 = scalar_lea.vmem %s1351_s0, %s921_s21  ;;  %s1278_s7 = scalar_lea.vmem %s1354_s3, %s921_s21 }
   0xf   : > { %977 = vmatprep.subr.mxu0 %v373_v1  ;;  %1056 = vmatprep.subr.mxu1 %v373_v1  ;;  %v365_v9 = vld [vmem:[%s1352_s1 + $0x30] sm:$0xff]  ;;  %v364_v10 = vld [vmem:[%s1352_s1 + $0x28] sm:$0xff]  ;;  %v363_v11 = vld [vmem:[%s1352_s1 + $0x20] sm:$0xff] }
  0x10   : > { %978 = vmatpush3.msra.mxu0 %v373_v1  ;;  %1072 = vmatpush3.msra.mxu1 %v373_v1  ;;  %v362_v12 = vld [vmem:[%s1352_s1 + $0x18] sm:$0xff]  ;;  %v361_v13 = vld [vmem:[%s1352_s1 + $0x10] sm:$0xff]  ;;  %v360_v14 = vld [vmem:[%s1352_s1 + $0x8] sm:$0xff] }
  0x11   : > { %979 = vmatprep.subr.mxu0 %v372_v2  ;;  %1057 = vmatprep.subr.mxu1 %v372_v2  ;;  %v359_v15 = vld [vmem:[%s1352_s1] sm:$0xff]  ;;  %v328_v18 = vld [vmem:[%s1229_s26 + $0x8] sm:$0xff]  ;;  %v329_v20 = vld [vmem:[%s1229_s26 + $0x10] sm:$0xff] }
  0x12   : > { %980 = vmatpush3.msra.mxu0 %v372_v2  ;;  %1073 = vmatpush3.msra.mxu1 %v372_v2  ;;  %v327_v16 = vld [vmem:[%s1229_s26] sm:$0xff]  ;;  %v344_v19 = vld [vmem:[%s1229_s26 + $0x88] sm:$0xff]  ;;  %v345_v21 = vld [vmem:[%s1229_s26 + $0x90] sm:$0xff] }
  0x13   : > { %981 = vmatprep.subr.mxu0 %v371_v3  ;;  %1058 = vmatprep.subr.mxu1 %v371_v3  ;;  %v343_v17 = vld [vmem:[%s1229_s26 + $0x80] sm:$0xff]  ;;  %v330_v22 = vld [vmem:[%s1229_s26 + $0x18] sm:$0xff]  ;;  %v332_v26 = vld [vmem:[%s1229_s26 + $0x28] sm:$0xff] }
  0x14   : > { %982 = vmatpush3.msra.mxu0 %v371_v3  ;;  %1074 = vmatpush3.msra.mxu1 %v371_v3  ;;  %v346_v23 = vld [vmem:[%s1229_s26 + $0x98] sm:$0xff]  ;;  %v331_v24 = vld [vmem:[%s1229_s26 + $0x20] sm:$0xff]  ;;  %v348_v27 = vld [vmem:[%s1229_s26 + $0xa8] sm:$0xff] }
  0x15   : > { %983 = vmatprep.subr.mxu0 %v370_v4  ;;  %1059 = vmatprep.subr.mxu1 %v370_v4  ;;  %v347_v25 = vld [vmem:[%s1229_s26 + $0xa0] sm:$0xff]  ;;  %v333_v28 = vld [vmem:[%s1229_s26 + $0x30] sm:$0xff]  ;;  %v334_v30 = vld [vmem:[%s1229_s26 + $0x38] sm:$0xff] }
  0x16   : > { %984 = vmatpush3.msra.mxu0 %v370_v4  ;;  %1075 = vmatpush3.msra.mxu1 %v370_v4  ;;  %v349_v29 = vld [vmem:[%s1229_s26 + $0xb0] sm:$0xff]  ;;  %v350_v31 = vld [vmem:[%s1229_s26 + $0xb8] sm:$0xff]  ;;  %v335_v32 = vld [vmem:[%s1229_s26 + $0x40] sm:$0xff] }
  0x17   : > { %985 = vmatprep.subr.mxu0 %v369_v5  ;;  %1060 = vmatprep.subr.mxu1 %v369_v5  ;;  %v351_v33 = vld [vmem:[%s1229_s26 + $0xc0] sm:$0xff]  ;;  %v336_v34 = vld [vmem:[%s1229_s26 + $0x48] sm:$0xff]  ;;  %v337_v36 = vld [vmem:[%s1229_s26 + $0x50] sm:$0xff] }
  0x18   : > { %986 = vmatpush3.msra.mxu0 %v369_v5  ;;  %1076 = vmatpush3.msra.mxu1 %v369_v5  ;;  %v352_v35 = vld [vmem:[%s1229_s26 + $0xc8] sm:$0xff]  ;;  %v353_v37 = vld [vmem:[%s1229_s26 + $0xd0] sm:$0xff]  ;;  %v338_v38 = vld [vmem:[%s1229_s26 + $0x58] sm:$0xff] }
  0x19   : > { %987 = vmatprep.subr.mxu0 %v368_v6  ;;  %1061 = vmatprep.subr.mxu1 %v368_v6  ;;  %v354_v39 = vld [vmem:[%s1229_s26 + $0xd8] sm:$0xff]  ;;  %v339_v40 = vld [vmem:[%s1229_s26 + $0x60] sm:$0xff]  ;;  %v340_v42 = vld [vmem:[%s1229_s26 + $0x68] sm:$0xff] }
  0x1a   : > { %988 = vmatpush3.msra.mxu0 %v368_v6  ;;  %1077 = vmatpush3.msra.mxu1 %v368_v6  ;;  %v355_v41 = vld [vmem:[%s1229_s26 + $0xe0] sm:$0xff]  ;;  %v356_v43 = vld [vmem:[%s1229_s26 + $0xe8] sm:$0xff]  ;;  %v341_v44 = vld [vmem:[%s1229_s26 + $0x70] sm:$0xff] }
  0x1b   : > { %989 = vmatprep.subr.mxu0 %v367_v7  ;;  %1062 = vmatprep.subr.mxu1 %v367_v7  ;;  %v357_v45 = vld [vmem:[%s1229_s26 + $0xf0] sm:$0xff]  ;;  %v342_v46 = vld [vmem:[%s1229_s26 + $0x78] sm:$0xff]  ;;  %v1269_v48 = vld [vmem:[%s1353_s2] ss:$0 sm:$0xff] }
  0x1c   : > { %990 = vmatpush3.msra.mxu0 %v367_v7  ;;  %1078 = vmatpush3.msra.mxu1 %v367_v7  ;;  %v358_v47 = vld [vmem:[%s1229_s26 + $0xf8] sm:$0xff] }
  0x1d   : > { %991 = vmatprep.subr.mxu0 %v366_v8  ;;  %1063 = vmatprep.subr.mxu1 %v366_v8 }
  0x1e   : > { %992 = vmatpush3.msra.mxu0 %v366_v8  ;;  %1079 = vmatpush3.msra.mxu1 %v366_v8 }
  0x1f   : > { %993 = vmatprep.subr.mxu0 %v365_v9  ;;  %1064 = vmatprep.subr.mxu1 %v365_v9 }
  0x20   : > { %994 = vmatpush3.msra.mxu0 %v365_v9  ;;  %1080 = vmatpush3.msra.mxu1 %v365_v9 }
  0x21   : > { %995 = vmatprep.subr.mxu0 %v364_v10  ;;  %1065 = vmatprep.subr.mxu1 %v364_v10 }
  0x22   : > { %996 = vmatpush3.msra.mxu0 %v364_v10  ;;  %1081 = vmatpush3.msra.mxu1 %v364_v10 }
  0x23   : > { %997 = vmatprep.subr.mxu0 %v363_v11  ;;  %1066 = vmatprep.subr.mxu1 %v363_v11 }
  0x24   : > { %998 = vmatpush3.msra.mxu0 %v363_v11  ;;  %1082 = vmatpush3.msra.mxu1 %v363_v11 }
  0x25   : > { %999 = vmatprep.subr.mxu0 %v362_v12  ;;  %1067 = vmatprep.subr.mxu1 %v362_v12 }
  0x26   : > { %1000 = vmatpush3.msra.mxu0 %v362_v12  ;;  %1083 = vmatpush3.msra.mxu1 %v362_v12 }
  0x27   : > { %1001 = vmatprep.subr.mxu0 %v361_v13  ;;  %1068 = vmatprep.subr.mxu1 %v361_v13 }
  0x28   : > { %1002 = vmatpush3.msra.mxu0 %v361_v13  ;;  %1084 = vmatpush3.msra.mxu1 %v361_v13 }
  0x29   : > { %1003 = vmatprep.subr.mxu0 %v360_v14  ;;  %1069 = vmatprep.subr.mxu1 %v360_v14 }
  0x2a   : > { %1004 = vmatpush3.msra.mxu0 %v360_v14  ;;  %1085 = vmatpush3.msra.mxu1 %v360_v14 }
  0x2b   : > { %1005 = vmatprep.subr.mxu0 %v359_v15  ;;  %1070 = vmatprep.subr.mxu1 %v359_v15 }
  0x2c   : > { %1006 = vmatpush3.msra.mxu0 %v359_v15  ;;  %1086 = vmatpush3.msra.mxu1 %v359_v15 }
  0x2d   : > { %1007 = vmatprep.mubr.f32.mxu0 %v327_v16  ;;  %1031 = vmatprep.mubr.f32.mxu1 %v343_v17 }
  0x2e   : > { %1008 = vmatmul.mubr.f32.vlgmr.msra.gmra.mxu0 %v328_v18  ;;  %1032 = vmatmul.mubr.f32.vlgmr.msra.gmra.mxu1 %v344_v19 }
  0x2f   : > { %1010 = vmatprep.mubr.f32.mxu0 %v329_v20  ;;  %1034 = vmatprep.mubr.f32.mxu1 %v345_v21 }
  0x32   : > { %1011 = vmatmul.mubr.f32.gmra.mxu0 %v330_v22  ;;  %1035 = vmatmul.mubr.f32.gmra.mxu1 %v346_v23 }
  0x33   : > { %1013 = vmatprep.mubr.f32.mxu0 %v331_v24  ;;  %1037 = vmatprep.mubr.f32.mxu1 %v347_v25 }
  0x36   : > { %1014 = vmatmul.mubr.f32.gmra.mxu0 %v332_v26  ;;  %1038 = vmatmul.mubr.f32.gmra.mxu1 %v348_v27 }
  0x37   : > { %1016 = vmatprep.mubr.f32.mxu0 %v333_v28  ;;  %1040 = vmatprep.mubr.f32.mxu1 %v349_v29 }
  0x3a   : > { %1017 = vmatmul.mubr.f32.gmra.mxu0 %v334_v30  ;;  %1041 = vmatmul.mubr.f32.gmra.mxu1 %v350_v31 }
  0x3b   : > { %1019 = vmatprep.mubr.f32.mxu0 %v335_v32  ;;  %1043 = vmatprep.mubr.f32.mxu1 %v351_v33 }
  0x3e   : > { %1020 = vmatmul.mubr.f32.gmra.mxu0 %v336_v34  ;;  %1044 = vmatmul.mubr.f32.gmra.mxu1 %v352_v35 }
  0x3f   : > { %1022 = vmatprep.mubr.f32.mxu0 %v337_v36  ;;  %1046 = vmatprep.mubr.f32.mxu1 %v353_v37 }
  0x42   : > { %1023 = vmatmul.mubr.f32.gmra.mxu0 %v338_v38  ;;  %1047 = vmatmul.mubr.f32.gmra.mxu1 %v354_v39 }
  0x43   : > { %1025 = vmatprep.mubr.f32.mxu0 %v339_v40  ;;  %1049 = vmatprep.mubr.f32.mxu1 %v355_v41 }
  0x46   : > { %1026 = vmatmul.mubr.f32.gmra.mxu0 %v340_v42  ;;  %1050 = vmatmul.mubr.f32.gmra.mxu1 %v356_v43 }
  0x47   : > { %1028 = vmatprep.mubr.f32.mxu0 %v341_v44  ;;  %1052 = vmatprep.mubr.f32.mxu1 %v357_v45 }
  0x4a   : > { %1029 = vmatmul.mubr.f32.gmra.mxu0 %v342_v46  ;;  %1053 = vmatmul.mubr.f32.gmra.mxu1 %v358_v47 }
  0xee   : > { %v1009_v49 = vpop.f32.mrf.mxu0  ;;  %v1033_v50 = vpop.f32.mrf.mxu1 }
  0xef   : > { %v707_v51 = vadd.f32 %v1009_v49, %v1269_v48  ;;  %v723_v52 = vadd.f32 %v1033_v50, %v1269_v48 }
  0xf0   : > { %v441_v53 = vpop.f32.mrf.mxu0  ;;  %v521_v54 = vpop.f32.mrf.mxu1 }
  0xf1   : > { %v739_v55 = vmax.f32 %v707_v51, 0.0  ;;  %v755_v56 = vmax.f32 %v723_v52, 0.0  ;;  %v706_v57 = vadd.f32 %v1269_v48, %v441_v53  ;;  %v722_v58 = vadd.f32 %v1269_v48, %v521_v54 }
  0xf2   : > { %v1012_v59 = vpop.f32.mrf.mxu0  ;;  %v1036_v60 = vpop.f32.mrf.mxu1 }
  0xf3   : > { %771 = vst [vmem:[%s1278_s7 + $0x8] sm:$0xff] %v739_v55  ;;  %787 = vst [vmem:[%s1278_s7 + $0x88] sm:$0xff] %v755_v56  ;;  %v738_v61 = vmax.f32 %v706_v57, 0.0  ;;  %v754_v62 = vmax.f32 %v722_v58, 0.0  ;;  %v709_v63 = vadd.f32 %v1012_v59, %v1269_v48  ;;  %v725_v0 = vadd.f32 %v1036_v60, %v1269_v48 }
  0xf4   : > { %v451_v1 = vpop.f32.mrf.mxu0  ;;  %v531_v2 = vpop.f32.mrf.mxu1 }
  0xf5   : > { %770 = vst [vmem:[%s1278_s7] sm:$0xff] %v738_v61  ;;  %786 = vst [vmem:[%s1278_s7 + $0x80] sm:$0xff] %v754_v62  ;;  %v741_v3 = vmax.f32 %v709_v63, 0.0  ;;  %v757_v4 = vmax.f32 %v725_v0, 0.0  ;;  %v708_v5 = vadd.f32 %v1269_v48, %v451_v1  ;;  %v724_v6 = vadd.f32 %v1269_v48, %v531_v2 }
  0xf6   : > { %v1015_v7 = vpop.f32.mrf.mxu0  ;;  %v1039_v8 = vpop.f32.mrf.mxu1 }
  0xf7   : > { %773 = vst [vmem:[%s1278_s7 + $0x18] sm:$0xff] %v741_v3  ;;  %789 = vst [vmem:[%s1278_s7 + $0x98] sm:$0xff] %v757_v4  ;;  %v740_v9 = vmax.f32 %v708_v5, 0.0  ;;  %v756_v10 = vmax.f32 %v724_v6, 0.0  ;;  %v711_v11 = vadd.f32 %v1015_v7, %v1269_v48  ;;  %v727_v12 = vadd.f32 %v1039_v8, %v1269_v48 }
  0xf8   : > { %v461_v13 = vpop.f32.mrf.mxu0  ;;  %v541_v14 = vpop.f32.mrf.mxu1 }
  0xf9   : > { %772 = vst [vmem:[%s1278_s7 + $0x10] sm:$0xff] %v740_v9  ;;  %788 = vst [vmem:[%s1278_s7 + $0x90] sm:$0xff] %v756_v10  ;;  %v743_v15 = vmax.f32 %v711_v11, 0.0  ;;  %v759_v16 = vmax.f32 %v727_v12, 0.0  ;;  %v710_v17 = vadd.f32 %v1269_v48, %v461_v13  ;;  %v726_v18 = vadd.f32 %v1269_v48, %v541_v14 }
  0xfa   : > { %v1018_v19 = vpop.f32.mrf.mxu0  ;;  %v1042_v20 = vpop.f32.mrf.mxu1 }
  0xfb   : > { %775 = vst [vmem:[%s1278_s7 + $0x28] sm:$0xff] %v743_v15  ;;  %791 = vst [vmem:[%s1278_s7 + $0xa8] sm:$0xff] %v759_v16  ;;  %v742_v21 = vmax.f32 %v710_v17, 0.0  ;;  %v758_v22 = vmax.f32 %v726_v18, 0.0  ;;  %v713_v23 = vadd.f32 %v1018_v19, %v1269_v48  ;;  %v729_v24 = vadd.f32 %v1042_v20, %v1269_v48 }
  0xfc   : > { %v471_v25 = vpop.f32.mrf.mxu0  ;;  %v551_v26 = vpop.f32.mrf.mxu1 }
  0xfd   : > { %774 = vst [vmem:[%s1278_s7 + $0x20] sm:$0xff] %v742_v21  ;;  %790 = vst [vmem:[%s1278_s7 + $0xa0] sm:$0xff] %v758_v22  ;;  %v745_v27 = vmax.f32 %v713_v23, 0.0  ;;  %v761_v28 = vmax.f32 %v729_v24, 0.0  ;;  %v712_v29 = vadd.f32 %v1269_v48, %v471_v25  ;;  %v728_v30 = vadd.f32 %v1269_v48, %v551_v26 }
  0xfe   : > { %v1021_v31 = vpop.f32.mrf.mxu0  ;;  %v1045_v32 = vpop.f32.mrf.mxu1 }
  0xff   : > { %777 = vst [vmem:[%s1278_s7 + $0x38] sm:$0xff] %v745_v27  ;;  %793 = vst [vmem:[%s1278_s7 + $0xb8] sm:$0xff] %v761_v28  ;;  %v744_v33 = vmax.f32 %v712_v29, 0.0  ;;  %v760_v34 = vmax.f32 %v728_v30, 0.0  ;;  %v715_v35 = vadd.f32 %v1021_v31, %v1269_v48  ;;  %v731_v36 = vadd.f32 %v1045_v32, %v1269_v48 }
 0x100   : > { %v481_v37 = vpop.f32.mrf.mxu0  ;;  %v561_v38 = vpop.f32.mrf.mxu1 }
 0x101   : > { %776 = vst [vmem:[%s1278_s7 + $0x30] sm:$0xff] %v744_v33  ;;  %792 = vst [vmem:[%s1278_s7 + $0xb0] sm:$0xff] %v760_v34  ;;  %v747_v39 = vmax.f32 %v715_v35, 0.0  ;;  %v763_v40 = vmax.f32 %v731_v36, 0.0  ;;  %v714_v41 = vadd.f32 %v1269_v48, %v481_v37  ;;  %v730_v42 = vadd.f32 %v1269_v48, %v561_v38 }
 0x102   : > { %v1024_v43 = vpop.f32.mrf.mxu0  ;;  %v1048_v44 = vpop.f32.mrf.mxu1 }
 0x103   : > { %779 = vst [vmem:[%s1278_s7 + $0x48] sm:$0xff] %v747_v39  ;;  %795 = vst [vmem:[%s1278_s7 + $0xc8] sm:$0xff] %v763_v40  ;;  %v746_v45 = vmax.f32 %v714_v41, 0.0  ;;  %v762_v46 = vmax.f32 %v730_v42, 0.0  ;;  %v717_v47 = vadd.f32 %v1024_v43, %v1269_v48  ;;  %v733_v49 = vadd.f32 %v1048_v44, %v1269_v48 }
 0x104   : > { %v491_v50 = vpop.f32.mrf.mxu0  ;;  %v571_v51 = vpop.f32.mrf.mxu1 }
 0x105   : > { %778 = vst [vmem:[%s1278_s7 + $0x40] sm:$0xff] %v746_v45  ;;  %794 = vst [vmem:[%s1278_s7 + $0xc0] sm:$0xff] %v762_v46  ;;  %v749_v52 = vmax.f32 %v717_v47, 0.0  ;;  %v765_v53 = vmax.f32 %v733_v49, 0.0  ;;  %v716_v54 = vadd.f32 %v1269_v48, %v491_v50  ;;  %v732_v55 = vadd.f32 %v1269_v48, %v571_v51 }
 0x106   : > { %v1027_v56 = vpop.f32.mrf.mxu0  ;;  %v1051_v57 = vpop.f32.mrf.mxu1 }
 0x107   : > { %781 = vst [vmem:[%s1278_s7 + $0x58] sm:$0xff] %v749_v52  ;;  %797 = vst [vmem:[%s1278_s7 + $0xd8] sm:$0xff] %v765_v53  ;;  %v748_v58 = vmax.f32 %v716_v54, 0.0  ;;  %v764_v59 = vmax.f32 %v732_v55, 0.0  ;;  %v719_v60 = vadd.f32 %v1027_v56, %v1269_v48  ;;  %v735_v61 = vadd.f32 %v1051_v57, %v1269_v48 }
 0x108   : > { %v501_v62 = vpop.f32.mrf.mxu0  ;;  %v581_v63 = vpop.f32.mrf.mxu1 }
 0x109   : > { %780 = vst [vmem:[%s1278_s7 + $0x50] sm:$0xff] %v748_v58  ;;  %796 = vst [vmem:[%s1278_s7 + $0xd0] sm:$0xff] %v764_v59  ;;  %v751_v0 = vmax.f32 %v719_v60, 0.0  ;;  %v767_v1 = vmax.f32 %v735_v61, 0.0  ;;  %v718_v2 = vadd.f32 %v1269_v48, %v501_v62  ;;  %v734_v3 = vadd.f32 %v1269_v48, %v581_v63 }
 0x10a   : > { %v1030_v4 = vpop.f32.mrf.mxu0  ;;  %v1054_v5 = vpop.f32.mrf.mxu1 }
 0x10b   : > { %783 = vst [vmem:[%s1278_s7 + $0x68] sm:$0xff] %v751_v0  ;;  %799 = vst [vmem:[%s1278_s7 + $0xe8] sm:$0xff] %v767_v1  ;;  %v750_v6 = vmax.f32 %v718_v2, 0.0  ;;  %v766_v7 = vmax.f32 %v734_v3, 0.0  ;;  %v721_v8 = vadd.f32 %v1030_v4, %v1269_v48  ;;  %v737_v9 = vadd.f32 %v1054_v5, %v1269_v48 }
 0x10c   : > { %v511_v10 = vpop.f32.mrf.mxu0  ;;  %v591_v11 = vpop.f32.mrf.mxu1 }
 0x10d   : > { %782 = vst [vmem:[%s1278_s7 + $0x60] sm:$0xff] %v750_v6  ;;  %798 = vst [vmem:[%s1278_s7 + $0xe0] sm:$0xff] %v766_v7  ;;  %v753_v12 = vmax.f32 %v721_v8, 0.0  ;;  %v769_v13 = vmax.f32 %v737_v9, 0.0  ;;  %v720_v14 = vadd.f32 %v1269_v48, %v511_v10  ;;  %v736_v15 = vadd.f32 %v1269_v48, %v591_v11 }
 0x10f   : > { %785 = vst [vmem:[%s1278_s7 + $0x78] sm:$0xff] %v753_v12  ;;  %801 = vst [vmem:[%s1278_s7 + $0xf8] sm:$0xff] %v769_v13  ;;  %v752_v16 = vmax.f32 %v720_v14, 0.0  ;;  %v768_v17 = vmax.f32 %v736_v15, 0.0 }
 0x111   : > { %784 = vst [vmem:[%s1278_s7 + $0x70] sm:$0xff] %v752_v16  ;;  %800 = vst [vmem:[%s1278_s7 + $0xf0] sm:$0xff] %v768_v17 }
 0x112 PF: > { %s13_s14 = sadd.s32 1, %s1133_s14   ;;  %s1355_s12 = smov %s1129_s13 }
 0x113   : > { %p10_p5 = scmp.ge.s32.totalorder %s13_s14, 9   ;;  %s1356_s13 = smov %s1358_s15 }
 0x115   :  { %12 = sbr.rel (!%p10_p5) target bundleno = 2 (0x2), region = 76 }

// kernel: convnet_forward.8
= control target key start
LH: loop header
LB: loop body
LE: loop exit
PB: predicated region body
PF: predicated region fallthrough
CT: control target
= control target key end

     0   :  { %s673_s15 = smov 0   ;;  %s869_s0 = inlined_call_operand.vmem [shape: f32[512,128], index: 0, kind: input, shape index: {}]   ;;  %s870_s1 = inlined_call_operand.vmem [shape: f32[512,128], index: 1, kind: input, shape index: {}]   ;;  %s871_s2 = inlined_call_operand.vmem [shape: f32[512,128], index: 2, kind: input, shape index: {}]   ;;  %s872_s3 = inlined_call_operand.vmem [shape: f32[512,128], index: 3, kind: input, shape index: {}]   ;;  %s873_s4 = inlined_call_operand.vmem [shape: f32[512,128], index: 4, kind: output, shape index: {}]  }
   0x1 LB: > { %s615_s16 = sadd.s32 4294967295, %s646_s15   ;;  %p619_p0 = scmp.ge.s32.totalorder %s646_s15, 1  ;;  %s646_s15 = sphi %s673_s15, %s14_s15  }
   0x2   : > { %p196_p1 = scmp.lt.s32.totalorder %s646_s15, 3 }
   0x4   : > { %p197_p2 = pnand %p619_p0, %p196_p1 }
   0x5   : > { %s620_s17 = sshll.u32 (!%p197_p2), %s615_s16, 5 }
   0x6   : > { %200 = sbr.rel (%p197_p2) target bundleno = 66 (0x42), region = 36  ;;  %p238_p3 = scmp.lt.s32.totalorder (!%p197_p2), %s620_s17, 63 }
   0xb   : > { %s875_s17 = smov (!%p238_p3, %s620_s17), 63 }
   0xc   : > { %s621_s18 = sshll.u32 %s875_s17, 3 }
   0xd   : > { %s684_s21 = scalar_lea.vmem %s869_s0, %s621_s18  ;;  %s689_s24 = scalar_lea.vmem %s870_s1, %s621_s18 }
   0xe   : > { %s694_s27 = scalar_lea.vmem %s871_s2, %s621_s18  ;;  %s699_s30 = scalar_lea.vmem %s872_s3, %s621_s18  ;;  %v267_v0 = vld [vmem:[%s684_s21] sm:$0xff]  ;;  %v268_v2 = vld [vmem:[%s684_s21 + $0x8] sm:$0xff]  ;;  %v269_v11 = vld [vmem:[%s684_s21 + $0x10] sm:$0xff] }
   0xf   : > { %v299_v1 = vld [vmem:[%s689_s24] sm:$0xff]  ;;  %v300_v6 = vld [vmem:[%s689_s24 + $0x8] sm:$0xff]  ;;  %s713_s7 = scalar_lea.vmem %s873_s4, %s621_s18  ;;  %v301_v13 = vld [vmem:[%s689_s24 + $0x10] sm:$0xff] }
  0x10   : > { %v331_v3 = vmax.f32 %v267_v0, %v299_v1  ;;  %v363_v4 = vld [vmem:[%s694_s27] sm:$0xff]  ;;  %v332_v8 = vmax.f32 %v268_v2, %v300_v6  ;;  %v364_v9 = vld [vmem:[%s694_s27 + $0x8] sm:$0xff]  ;;  %v365_v14 = vld [vmem:[%s694_s27 + $0x10] sm:$0xff]  ;;  %v333_v17 = vmax.f32 %v269_v11, %v301_v13 }
  0x11   : > { %v395_v5 = vld [vmem:[%s699_s30] sm:$0xff]  ;;  %v396_v10 = vld [vmem:[%s699_s30 + $0x8] sm:$0xff]  ;;  %v397_v15 = vld [vmem:[%s699_s30 + $0x10] sm:$0xff] }
  0x12   : > { %v427_v7 = vmax.f32 %v363_v4, %v395_v5  ;;  %v428_v12 = vmax.f32 %v364_v9, %v396_v10  ;;  %v429_v18 = vmax.f32 %v365_v14, %v397_v15  ;;  %v270_v19 = vld [vmem:[%s684_s21 + $0x18] sm:$0xff]  ;;  %v271_v25 = vld [vmem:[%s684_s21 + $0x20] sm:$0xff]  ;;  %v272_v32 = vld [vmem:[%s684_s21 + $0x28] sm:$0xff] }
  0x13   : > { %v302_v20 = vld [vmem:[%s689_s24 + $0x18] sm:$0xff]  ;;  %v303_v26 = vld [vmem:[%s689_s24 + $0x20] sm:$0xff]  ;;  %v304_v34 = vld [vmem:[%s689_s24 + $0x28] sm:$0xff] }
  0x14   : > { %v459_v16 = vmax.f32 %v331_v3, %v427_v7  ;;  %v366_v21 = vld [vmem:[%s694_s27 + $0x18] sm:$0xff]  ;;  %v460_v22 = vmax.f32 %v332_v8, %v428_v12  ;;  %v334_v23 = vmax.f32 %v270_v19, %v302_v20  ;;  %v461_v27 = vmax.f32 %v333_v17, %v429_v18  ;;  %v367_v30 = vld [vmem:[%s694_s27 + $0x20] sm:$0xff]  ;;  %v368_v35 = vld [vmem:[%s694_s27 + $0x28] sm:$0xff] }
  0x15   : > { %v398_v24 = vld [vmem:[%s699_s30 + $0x18] sm:$0xff]  ;;  %v335_v29 = vmax.f32 %v271_v25, %v303_v26  ;;  %v399_v31 = vld [vmem:[%s699_s30 + $0x20] sm:$0xff]  ;;  %v400_v36 = vld [vmem:[%s699_s30 + $0x28] sm:$0xff]  ;;  %v336_v38 = vmax.f32 %v272_v32, %v304_v34 }
  0x16   : > { %491 = vst [vmem:[%s713_s7] sm:$0xff] %v459_v16  ;;  %v430_v28 = vmax.f32 %v366_v21, %v398_v24  ;;  %492 = vst [vmem:[%s713_s7 + $0x8] sm:$0xff] %v460_v22  ;;  %v431_v33 = vmax.f32 %v367_v30, %v399_v31  ;;  %v432_v39 = vmax.f32 %v368_v35, %v400_v36  ;;  %v273_v40 = vld [vmem:[%s684_s21 + $0x30] sm:$0xff]  ;;  %v274_v46 = vld [vmem:[%s684_s21 + $0x38] sm:$0xff] }
  0x17   : > { %493 = vst [vmem:[%s713_s7 + $0x10] sm:$0xff] %v461_v27  ;;  %v305_v41 = vld [vmem:[%s689_s24 + $0x30] sm:$0xff]  ;;  %v306_v47 = vld [vmem:[%s689_s24 + $0x38] sm:$0xff]  ;;  %v275_v53 = vld [vmem:[%s684_s21 + $0x40] sm:$0xff] }
  0x18   : > { %v462_v37 = vmax.f32 %v334_v23, %v430_v28  ;;  %v369_v42 = vld [vmem:[%s694_s27 + $0x30] sm:$0xff]  ;;  %v463_v43 = vmax.f32 %v335_v29, %v431_v33  ;;  %v337_v44 = vmax.f32 %v273_v40, %v305_v41  ;;  %v464_v48 = vmax.f32 %v336_v38, %v432_v39  ;;  %v370_v51 = vld [vmem:[%s694_s27 + $0x38] sm:$0xff]  ;;  %v307_v55 = vld [vmem:[%s689_s24 + $0x40] sm:$0xff] }
  0x19   : > { %v401_v45 = vld [vmem:[%s699_s30 + $0x30] sm:$0xff]  ;;  %v338_v50 = vmax.f32 %v274_v46, %v306_v47  ;;  %v402_v52 = vld [vmem:[%s699_s30 + $0x38] sm:$0xff]  ;;  %v371_v56 = vld [vmem:[%s694_s27 + $0x40] sm:$0xff]  ;;  %v339_v59 = vmax.f32 %v275_v53, %v307_v55 }
  0x1a   : > { %494 = vst [vmem:[%s713_s7 + $0x18] sm:$0xff] %v462_v37  ;;  %v433_v49 = vmax.f32 %v369_v42, %v401_v45  ;;  %495 = vst [vmem:[%s713_s7 + $0x20] sm:$0xff] %v463_v43  ;;  %v434_v54 = vmax.f32 %v370_v51, %v402_v52  ;;  %v403_v57 = vld [vmem:[%s699_s30 + $0x40] sm:$0xff]  ;;  %v276_v61 = vld [vmem:[%s684_s21 + $0x48] sm:$0xff] }
  0x1b   : > { %496 = vst [vmem:[%s713_s7 + $0x28] sm:$0xff] %v464_v48  ;;  %v435_v60 = vmax.f32 %v371_v56, %v403_v57  ;;  %v308_v62 = vld [vmem:[%s689_s24 + $0x48] sm:$0xff]  ;;  %v277_v3 = vld [vmem:[%s684_s21 + $0x50] sm:$0xff]  ;;  %v278_v10 = vld [vmem:[%s684_s21 + $0x58] sm:$0xff] }
  0x1c   : > { %v465_v58 = vmax.f32 %v337_v44, %v433_v49  ;;  %v372_v63 = vld [vmem:[%s694_s27 + $0x48] sm:$0xff]  ;;  %v466_v0 = vmax.f32 %v338_v50, %v434_v54  ;;  %v340_v1 = vmax.f32 %v276_v61, %v308_v62  ;;  %v309_v4 = vld [vmem:[%s689_s24 + $0x50] sm:$0xff]  ;;  %v310_v12 = vld [vmem:[%s689_s24 + $0x58] sm:$0xff] }
  0x1d   : > { %v404_v2 = vld [vmem:[%s699_s30 + $0x48] sm:$0xff]  ;;  %v467_v5 = vmax.f32 %v339_v59, %v435_v60  ;;  %v341_v7 = vmax.f32 %v277_v3, %v309_v4  ;;  %v373_v8 = vld [vmem:[%s694_s27 + $0x50] sm:$0xff]  ;;  %v374_v13 = vld [vmem:[%s694_s27 + $0x58] sm:$0xff]  ;;  %v342_v16 = vmax.f32 %v278_v10, %v310_v12 }
  0x1e   : > { %497 = vst [vmem:[%s713_s7 + $0x30] sm:$0xff] %v465_v58  ;;  %v436_v6 = vmax.f32 %v372_v63, %v404_v2  ;;  %v405_v9 = vld [vmem:[%s699_s30 + $0x50] sm:$0xff]  ;;  %498 = vst [vmem:[%s713_s7 + $0x38] sm:$0xff] %v466_v0  ;;  %v406_v14 = vld [vmem:[%s699_s30 + $0x58] sm:$0xff] }
  0x1f   : > { %v437_v11 = vmax.f32 %v373_v8, %v405_v9  ;;  %499 = vst [vmem:[%s713_s7 + $0x40] sm:$0xff] %v467_v5  ;;  %v438_v17 = vmax.f32 %v374_v13, %v406_v14  ;;  %v279_v18 = vld [vmem:[%s684_s21 + $0x60] sm:$0xff]  ;;  %v280_v24 = vld [vmem:[%s684_s21 + $0x68] sm:$0xff]  ;;  %v281_v31 = vld [vmem:[%s684_s21 + $0x70] sm:$0xff] }
  0x20   : > { %v468_v15 = vmax.f32 %v340_v1, %v436_v6  ;;  %v311_v19 = vld [vmem:[%s689_s24 + $0x60] sm:$0xff]  ;;  %v312_v25 = vld [vmem:[%s689_s24 + $0x68] sm:$0xff]  ;;  %v313_v33 = vld [vmem:[%s689_s24 + $0x70] sm:$0xff] }
  0x21   : > { %v375_v20 = vld [vmem:[%s694_s27 + $0x60] sm:$0xff]  ;;  %v469_v21 = vmax.f32 %v341_v7, %v437_v11  ;;  %v343_v22 = vmax.f32 %v279_v18, %v311_v19  ;;  %v470_v26 = vmax.f32 %v342_v16, %v438_v17  ;;  %v344_v28 = vmax.f32 %v280_v24, %v312_v25  ;;  %v376_v29 = vld [vmem:[%s694_s27 + $0x68] sm:$0xff]  ;;  %v377_v34 = vld [vmem:[%s694_s27 + $0x70] sm:$0xff] }
  0x22   : > { %v407_v23 = vld [vmem:[%s699_s30 + $0x60] sm:$0xff]  ;;  %500 = vst [vmem:[%s713_s7 + $0x48] sm:$0xff] %v468_v15  ;;  %v408_v30 = vld [vmem:[%s699_s30 + $0x68] sm:$0xff]  ;;  %v409_v35 = vld [vmem:[%s699_s30 + $0x70] sm:$0xff]  ;;  %v345_v37 = vmax.f32 %v281_v31, %v313_v33 }
  0x23   : > { %v439_v27 = vmax.f32 %v375_v20, %v407_v23  ;;  %501 = vst [vmem:[%s713_s7 + $0x50] sm:$0xff] %v469_v21  ;;  %v440_v32 = vmax.f32 %v376_v29, %v408_v30  ;;  %502 = vst [vmem:[%s713_s7 + $0x58] sm:$0xff] %v470_v26  ;;  %v441_v38 = vmax.f32 %v377_v34, %v409_v35  ;;  %v282_v39 = vld [vmem:[%s684_s21 + $0x78] sm:$0xff]  ;;  %v283_v45 = vld [vmem:[%s684_s21 + $0x80] sm:$0xff] }
  0x24   : > { %v314_v40 = vld [vmem:[%s689_s24 + $0x78] sm:$0xff]  ;;  %v315_v46 = vld [vmem:[%s689_s24 + $0x80] sm:$0xff]  ;;  %v284_v52 = vld [vmem:[%s684_s21 + $0x88] sm:$0xff] }
  0x25   : > { %v471_v36 = vmax.f32 %v343_v22, %v439_v27  ;;  %v378_v41 = vld [vmem:[%s694_s27 + $0x78] sm:$0xff]  ;;  %v472_v42 = vmax.f32 %v344_v28, %v440_v32  ;;  %v346_v43 = vmax.f32 %v282_v39, %v314_v40  ;;  %v473_v47 = vmax.f32 %v345_v37, %v441_v38  ;;  %v379_v50 = vld [vmem:[%s694_s27 + $0x80] sm:$0xff]  ;;  %v316_v54 = vld [vmem:[%s689_s24 + $0x88] sm:$0xff] }
  0x26   : > { %v410_v44 = vld [vmem:[%s699_s30 + $0x78] sm:$0xff]  ;;  %v347_v49 = vmax.f32 %v283_v45, %v315_v46  ;;  %v411_v51 = vld [vmem:[%s699_s30 + $0x80] sm:$0xff]  ;;  %v380_v55 = vld [vmem:[%s694_s27 + $0x88] sm:$0xff]  ;;  %v348_v58 = vmax.f32 %v284_v52, %v316_v54 }
  0x27   : > { %503 = vst [vmem:[%s713_s7 + $0x60] sm:$0xff] %v471_v36  ;;  %v442_v48 = vmax.f32 %v378_v41, %v410_v44  ;;  %504 = vst [vmem:[%s713_s7 + $0x68] sm:$0xff] %v472_v42  ;;  %v443_v53 = vmax.f32 %v379_v50, %v411_v51  ;;  %v412_v56 = vld [vmem:[%s699_s30 + $0x88] sm:$0xff]  ;;  %v285_v60 = vld [vmem:[%s684_s21 + $0x90] sm:$0xff] }
  0x28   : > { %505 = vst [vmem:[%s713_s7 + $0x70] sm:$0xff] %v473_v47  ;;  %v444_v59 = vmax.f32 %v380_v55, %v412_v56  ;;  %v317_v61 = vld [vmem:[%s689_s24 + $0x90] sm:$0xff]  ;;  %v286_v2 = vld [vmem:[%s684_s21 + $0x98] sm:$0xff]  ;;  %v287_v9 = vld [vmem:[%s684_s21 + $0xa0] sm:$0xff] }
  0x29   : > { %v474_v57 = vmax.f32 %v346_v43, %v442_v48  ;;  %v381_v62 = vld [vmem:[%s694_s27 + $0x90] sm:$0xff]  ;;  %v475_v63 = vmax.f32 %v347_v49, %v443_v53  ;;  %v349_v0 = vmax.f32 %v285_v60, %v317_v61  ;;  %v318_v3 = vld [vmem:[%s689_s24 + $0x98] sm:$0xff]  ;;  %v319_v11 = vld [vmem:[%s689_s24 + $0xa0] sm:$0xff] }
  0x2a   : > { %v413_v1 = vld [vmem:[%s699_s30 + $0x90] sm:$0xff]  ;;  %v476_v4 = vmax.f32 %v348_v58, %v444_v59  ;;  %v350_v6 = vmax.f32 %v286_v2, %v318_v3  ;;  %v382_v7 = vld [vmem:[%s694_s27 + $0x98] sm:$0xff]  ;;  %v383_v12 = vld [vmem:[%s694_s27 + $0xa0] sm:$0xff]  ;;  %v351_v15 = vmax.f32 %v287_v9, %v319_v11 }
  0x2b   : > { %506 = vst [vmem:[%s713_s7 + $0x78] sm:$0xff] %v474_v57  ;;  %v445_v5 = vmax.f32 %v381_v62, %v413_v1  ;;  %v414_v8 = vld [vmem:[%s699_s30 + $0x98] sm:$0xff]  ;;  %507 = vst [vmem:[%s713_s7 + $0x80] sm:$0xff] %v475_v63  ;;  %v415_v13 = vld [vmem:[%s699_s30 + $0xa0] sm:$0xff] }
  0x2c   : > { %v446_v10 = vmax.f32 %v382_v7, %v414_v8  ;;  %508 = vst [vmem:[%s713_s7 + $0x88] sm:$0xff] %v476_v4  ;;  %v447_v16 = vmax.f32 %v383_v12, %v415_v13  ;;  %v288_v17 = vld [vmem:[%s684_s21 + $0xa8] sm:$0xff]  ;;  %v289_v23 = vld [vmem:[%s684_s21 + $0xb0] sm:$0xff]  ;;  %v290_v30 = vld [vmem:[%s684_s21 + $0xb8] sm:$0xff] }
  0x2d   : > { %v477_v14 = vmax.f32 %v349_v0, %v445_v5  ;;  %v320_v18 = vld [vmem:[%s689_s24 + $0xa8] sm:$0xff]  ;;  %v321_v24 = vld [vmem:[%s689_s24 + $0xb0] sm:$0xff]  ;;  %v322_v32 = vld [vmem:[%s689_s24 + $0xb8] sm:$0xff] }
  0x2e   : > { %v384_v19 = vld [vmem:[%s694_s27 + $0xa8] sm:$0xff]  ;;  %v478_v20 = vmax.f32 %v350_v6, %v446_v10  ;;  %v352_v21 = vmax.f32 %v288_v17, %v320_v18  ;;  %v479_v25 = vmax.f32 %v351_v15, %v447_v16  ;;  %v353_v27 = vmax.f32 %v289_v23, %v321_v24  ;;  %v385_v28 = vld [vmem:[%s694_s27 + $0xb0] sm:$0xff]  ;;  %v386_v33 = vld [vmem:[%s694_s27 + $0xb8] sm:$0xff] }
  0x2f   : > { %v416_v22 = vld [vmem:[%s699_s30 + $0xa8] sm:$0xff]  ;;  %509 = vst [vmem:[%s713_s7 + $0x90] sm:$0xff] %v477_v14  ;;  %v417_v29 = vld [vmem:[%s699_s30 + $0xb0] sm:$0xff]  ;;  %v418_v34 = vld [vmem:[%s699_s30 + $0xb8] sm:$0xff]  ;;  %v354_v36 = vmax.f32 %v290_v30, %v322_v32 }
  0x30   : > { %v448_v26 = vmax.f32 %v384_v19, %v416_v22  ;;  %510 = vst [vmem:[%s713_s7 + $0x98] sm:$0xff] %v478_v20  ;;  %v449_v31 = vmax.f32 %v385_v28, %v417_v29  ;;  %511 = vst [vmem:[%s713_s7 + $0xa0] sm:$0xff] %v479_v25  ;;  %v450_v37 = vmax.f32 %v386_v33, %v418_v34  ;;  %v291_v38 = vld [vmem:[%s684_s21 + $0xc0] sm:$0xff]  ;;  %v292_v44 = vld [vmem:[%s684_s21 + $0xc8] sm:$0xff] }
  0x31   : > { %v323_v39 = vld [vmem:[%s689_s24 + $0xc0] sm:$0xff]  ;;  %v324_v45 = vld [vmem:[%s689_s24 + $0xc8] sm:$0xff]  ;;  %v293_v51 = vld [vmem:[%s684_s21 + $0xd0] sm:$0xff] }
  0x32   : > { %v480_v35 = vmax.f32 %v352_v21, %v448_v26  ;;  %v387_v40 = vld [vmem:[%s694_s27 + $0xc0] sm:$0xff]  ;;  %v481_v41 = vmax.f32 %v353_v27, %v449_v31  ;;  %v355_v42 = vmax.f32 %v291_v38, %v323_v39  ;;  %v482_v46 = vmax.f32 %v354_v36, %v450_v37  ;;  %v388_v49 = vld [vmem:[%s694_s27 + $0xc8] sm:$0xff]  ;;  %v325_v53 = vld [vmem:[%s689_s24 + $0xd0] sm:$0xff] }
  0x33   : > { %v419_v43 = vld [vmem:[%s699_s30 + $0xc0] sm:$0xff]  ;;  %v356_v48 = vmax.f32 %v292_v44, %v324_v45  ;;  %v420_v50 = vld [vmem:[%s699_s30 + $0xc8] sm:$0xff]  ;;  %v389_v54 = vld [vmem:[%s694_s27 + $0xd0] sm:$0xff]  ;;  %v357_v57 = vmax.f32 %v293_v51, %v325_v53 }
  0x34   : > { %512 = vst [vmem:[%s713_s7 + $0xa8] sm:$0xff] %v480_v35  ;;  %v451_v47 = vmax.f32 %v387_v40, %v419_v43  ;;  %513 = vst [vmem:[%s713_s7 + $0xb0] sm:$0xff] %v481_v41  ;;  %v452_v52 = vmax.f32 %v388_v49, %v420_v50  ;;  %v421_v55 = vld [vmem:[%s699_s30 + $0xd0] sm:$0xff]  ;;  %v294_v59 = vld [vmem:[%s684_s21 + $0xd8] sm:$0xff] }
  0x35   : > { %514 = vst [vmem:[%s713_s7 + $0xb8] sm:$0xff] %v482_v46  ;;  %v453_v58 = vmax.f32 %v389_v54, %v421_v55  ;;  %v326_v60 = vld [vmem:[%s689_s24 + $0xd8] sm:$0xff]  ;;  %v295_v1 = vld [vmem:[%s684_s21 + $0xe0] sm:$0xff]  ;;  %v296_v8 = vld [vmem:[%s684_s21 + $0xe8] sm:$0xff] }
  0x36   : > { %v483_v56 = vmax.f32 %v355_v42, %v451_v47  ;;  %v390_v61 = vld [vmem:[%s694_s27 + $0xd8] sm:$0xff]  ;;  %v484_v62 = vmax.f32 %v356_v48, %v452_v52  ;;  %v358_v63 = vmax.f32 %v294_v59, %v326_v60  ;;  %v327_v2 = vld [vmem:[%s689_s24 + $0xe0] sm:$0xff]  ;;  %v328_v10 = vld [vmem:[%s689_s24 + $0xe8] sm:$0xff] }
  0x37   : > { %v422_v0 = vld [vmem:[%s699_s30 + $0xd8] sm:$0xff]  ;;  %v485_v3 = vmax.f32 %v357_v57, %v453_v58  ;;  %v359_v5 = vmax.f32 %v295_v1, %v327_v2  ;;  %v391_v6 = vld [vmem:[%s694_s27 + $0xe0] sm:$0xff]  ;;  %v392_v11 = vld [vmem:[%s694_s27 + $0xe8] sm:$0xff]  ;;  %v360_v14 = vmax.f32 %v296_v8, %v328_v10 }
  0x38   : > { %515 = vst [vmem:[%s713_s7 + $0xc0] sm:$0xff] %v483_v56  ;;  %v454_v4 = vmax.f32 %v390_v61, %v422_v0  ;;  %v423_v7 = vld [vmem:[%s699_s30 + $0xe0] sm:$0xff]  ;;  %516 = vst [vmem:[%s713_s7 + $0xc8] sm:$0xff] %v484_v62  ;;  %v424_v12 = vld [vmem:[%s699_s30 + $0xe8] sm:$0xff] }
  0x39   : > { %v455_v9 = vmax.f32 %v391_v6, %v423_v7  ;;  %517 = vst [vmem:[%s713_s7 + $0xd0] sm:$0xff] %v485_v3  ;;  %v456_v15 = vmax.f32 %v392_v11, %v424_v12  ;;  %v297_v16 = vld [vmem:[%s684_s21 + $0xf0] sm:$0xff]  ;;  %v298_v22 = vld [vmem:[%s684_s21 + $0xf8] sm:$0xff] }
  0x3a   : > { %v486_v13 = vmax.f32 %v358_v63, %v454_v4  ;;  %v329_v17 = vld [vmem:[%s689_s24 + $0xf0] sm:$0xff]  ;;  %v330_v23 = vld [vmem:[%s689_s24 + $0xf8] sm:$0xff] }
  0x3b   : > { %v393_v18 = vld [vmem:[%s694_s27 + $0xf0] sm:$0xff]  ;;  %v487_v19 = vmax.f32 %v359_v5, %v455_v9  ;;  %v361_v20 = vmax.f32 %v297_v16, %v329_v17  ;;  %v488_v24 = vmax.f32 %v360_v14, %v456_v15  ;;  %v362_v26 = vmax.f32 %v298_v22, %v330_v23  ;;  %v394_v27 = vld [vmem:[%s694_s27 + $0xf8] sm:$0xff] }
  0x3c   : > { %v425_v21 = vld [vmem:[%s699_s30 + $0xf0] sm:$0xff]  ;;  %518 = vst [vmem:[%s713_s7 + $0xd8] sm:$0xff] %v486_v13  ;;  %v426_v28 = vld [vmem:[%s699_s30 + $0xf8] sm:$0xff] }
  0x3d   : > { %v457_v25 = vmax.f32 %v393_v18, %v425_v21  ;;  %519 = vst [vmem:[%s713_s7 + $0xe0] sm:$0xff] %v487_v19  ;;  %v458_v29 = vmax.f32 %v394_v27, %v426_v28  ;;  %520 = vst [vmem:[%s713_s7 + $0xe8] sm:$0xff] %v488_v24 }
  0x3f   : > { %v489_v30 = vmax.f32 %v361_v20, %v457_v25  ;;  %v490_v31 = vmax.f32 %v362_v26, %v458_v29 }
  0x41   : > { %521 = vst [vmem:[%s713_s7 + $0xf0] sm:$0xff] %v489_v30  ;;  %522 = vst [vmem:[%s713_s7 + $0xf8] sm:$0xff] %v490_v31 }
  0x42 PF: > { %s14_s15 = sadd.s32 1, %s646_s15  }
  0x43   : > { %p11_p4 = scmp.ge.s32.totalorder %s14_s15, 4  }
  0x45   :  { %13 = sbr.rel (!%p11_p4) target bundleno = 1 (0x1), region = 75 }

// kernel: convnet_forward.9
= control target key start
LH: loop header
LB: loop body
LE: loop exit
PB: predicated region body
PF: predicated region fallthrough
CT: control target
= control target key end

     0   :  { %v570_v0 = vmov 0.0   ;;  %s1006_s1 = inlined_call_operand.vmem [shape: f32[256,128], index: 1, kind: input, shape index: {}]   ;;  %s1007_s0 = inlined_call_operand.vmem [shape: f32[200,256], index: 0, kind: input, shape index: {}]   ;;  %s1008_s2 = inlined_call_operand.vmem [shape: f32[1,128], index: 2, kind: input, shape index: {}]   ;;  %s1009_s3 = inlined_call_operand.vmem [shape: f32[200,128], index: 3, kind: output, shape index: {}]  }
   0x1   :  { %150 = vmatprep.subr.mxu0 %v570_v0  ;;  %v133_v1 = vld [vmem:[%s1006_s1 + $0x78] sm:$0xff]  ;;  %505 = vmatprep.subr.mxu1 %v570_v0  ;;  %v132_v2 = vld [vmem:[%s1006_s1 + $0x70] sm:$0xff]  ;;  %v131_v3 = vld [vmem:[%s1006_s1 + $0x68] sm:$0xff] }
   0x2   :  { %151 = vmatpush1.msra.mxu0 %v133_v1  ;;  %537 = vmatpush1.msra.mxu1 %v133_v1  ;;  %v130_v4 = vld [vmem:[%s1006_s1 + $0x60] sm:$0xff]  ;;  %v129_v5 = vld [vmem:[%s1006_s1 + $0x58] sm:$0xff]  ;;  %v128_v6 = vld [vmem:[%s1006_s1 + $0x50] sm:$0xff] }
   0x3   :  { %152 = vmatprep.subr.mxu0 %v570_v0  ;;  %506 = vmatprep.subr.mxu1 %v570_v0  ;;  %v127_v7 = vld [vmem:[%s1006_s1 + $0x48] sm:$0xff]  ;;  %v126_v8 = vld [vmem:[%s1006_s1 + $0x40] sm:$0xff]  ;;  %v125_v9 = vld [vmem:[%s1006_s1 + $0x38] sm:$0xff] }
   0x4   :  { %153 = vmatpush1.msra.mxu0 %v132_v2  ;;  %538 = vmatpush1.msra.mxu1 %v132_v2  ;;  %v124_v10 = vld [vmem:[%s1006_s1 + $0x30] sm:$0xff]  ;;  %v123_v11 = vld [vmem:[%s1006_s1 + $0x28] sm:$0xff]  ;;  %v122_v12 = vld [vmem:[%s1006_s1 + $0x20] sm:$0xff] }
   0x5   :  { %154 = vmatprep.subr.mxu0 %v570_v0  ;;  %507 = vmatprep.subr.mxu1 %v570_v0  ;;  %v121_v13 = vld [vmem:[%s1006_s1 + $0x18] sm:$0xff]  ;;  %v120_v14 = vld [vmem:[%s1006_s1 + $0x10] sm:$0xff]  ;;  %v119_v15 = vld [vmem:[%s1006_s1 + $0x8] sm:$0xff] }
   0x6   :  { %155 = vmatpush1.msra.mxu0 %v131_v3  ;;  %539 = vmatpush1.msra.mxu1 %v131_v3  ;;  %v118_v16 = vld [vmem:[%s1006_s1] sm:$0xff]  ;;  %v149_v17 = vld [vmem:[%s1006_s1 + $0xf8] sm:$0xff]  ;;  %v148_v18 = vld [vmem:[%s1006_s1 + $0xf0] sm:$0xff] }
   0x7   :  { %156 = vmatprep.subr.mxu0 %v570_v0  ;;  %508 = vmatprep.subr.mxu1 %v570_v0  ;;  %v147_v19 = vld [vmem:[%s1006_s1 + $0xe8] sm:$0xff]  ;;  %v146_v20 = vld [vmem:[%s1006_s1 + $0xe0] sm:$0xff]  ;;  %v145_v21 = vld [vmem:[%s1006_s1 + $0xd8] sm:$0xff] }
   0x8   :  { %157 = vmatpush1.msra.mxu0 %v130_v4  ;;  %540 = vmatpush1.msra.mxu1 %v130_v4  ;;  %v144_v22 = vld [vmem:[%s1006_s1 + $0xd0] sm:$0xff]  ;;  %v143_v23 = vld [vmem:[%s1006_s1 + $0xc8] sm:$0xff]  ;;  %v142_v24 = vld [vmem:[%s1006_s1 + $0xc0] sm:$0xff] }
   0x9   :  { %158 = vmatprep.subr.mxu0 %v570_v0  ;;  %509 = vmatprep.subr.mxu1 %v570_v0  ;;  %v141_v25 = vld [vmem:[%s1006_s1 + $0xb8] sm:$0xff]  ;;  %v140_v26 = vld [vmem:[%s1006_s1 + $0xb0] sm:$0xff]  ;;  %v139_v27 = vld [vmem:[%s1006_s1 + $0xa8] sm:$0xff] }
   0xa   :  { %159 = vmatpush1.msra.mxu0 %v129_v5  ;;  %541 = vmatpush1.msra.mxu1 %v129_v5  ;;  %v138_v28 = vld [vmem:[%s1006_s1 + $0xa0] sm:$0xff]  ;;  %v137_v29 = vld [vmem:[%s1006_s1 + $0x98] sm:$0xff]  ;;  %v136_v30 = vld [vmem:[%s1006_s1 + $0x90] sm:$0xff] }
   0xb   :  { %160 = vmatprep.subr.mxu0 %v570_v0  ;;  %510 = vmatprep.subr.mxu1 %v570_v0  ;;  %v135_v31 = vld [vmem:[%s1006_s1 + $0x88] sm:$0xff]  ;;  %v134_v33 = vld [vmem:[%s1006_s1 + $0x80] sm:$0xff]  ;;  %v95_v35 = vld [vmem:[%s1007_s0 + $0xd8] sm:$0xff] }
   0xc   :  { %161 = vmatpush1.msra.mxu0 %v128_v6  ;;  %542 = vmatpush1.msra.mxu1 %v128_v6  ;;  %v69_v32 = vld [vmem:[%s1007_s0 + $0x8] sm:$0xff]  ;;  %v68_v34 = vld [vmem:[%s1007_s0] sm:$0xff]  ;;  %v71_v36 = vld [vmem:[%s1007_s0 + $0x18] sm:$0xff] }
   0xd   :  { %162 = vmatprep.subr.mxu0 %v570_v0  ;;  %511 = vmatprep.subr.mxu1 %v570_v0  ;;  %v94_v37 = vld [vmem:[%s1007_s0 + $0xd0] sm:$0xff]  ;;  %v97_v38 = vld [vmem:[%s1007_s0 + $0xe8] sm:$0xff]  ;;  %v96_v41 = vld [vmem:[%s1007_s0 + $0xe0] sm:$0xff] }
   0xe   :  { %163 = vmatpush1.msra.mxu0 %v127_v7  ;;  %543 = vmatpush1.msra.mxu1 %v127_v7  ;;  %v70_v39 = vld [vmem:[%s1007_s0 + $0x10] sm:$0xff]  ;;  %v73_v40 = vld [vmem:[%s1007_s0 + $0x28] sm:$0xff]  ;;  %v99_v42 = vld [vmem:[%s1007_s0 + $0xf8] sm:$0xff] }
   0xf   :  { %164 = vmatprep.subr.mxu0 %v570_v0  ;;  %512 = vmatprep.subr.mxu1 %v570_v0  ;;  %v72_v43 = vld [vmem:[%s1007_s0 + $0x20] sm:$0xff]  ;;  %v75_v44 = vld [vmem:[%s1007_s0 + $0x38] sm:$0xff]  ;;  %v98_v45 = vld [vmem:[%s1007_s0 + $0xf0] sm:$0xff] }
  0x10   :  { %165 = vmatpush1.msra.mxu0 %v126_v8  ;;  %544 = vmatpush1.msra.mxu1 %v126_v8  ;;  %v101_v46 = vld [vmem:[%s1007_s0 + $0x108] sm:$0xff]  ;;  %v74_v47 = vld [vmem:[%s1007_s0 + $0x30] sm:$0xff]  ;;  %v100_v49 = vld [vmem:[%s1007_s0 + $0x100] sm:$0xff] }
  0x11   :  { %166 = vmatprep.subr.mxu0 %v570_v0  ;;  %513 = vmatprep.subr.mxu1 %v570_v0  ;;  %v77_v48 = vld [vmem:[%s1007_s0 + $0x48] sm:$0xff]  ;;  %v103_v50 = vld [vmem:[%s1007_s0 + $0x118] sm:$0xff]  ;;  %v76_v51 = vld [vmem:[%s1007_s0 + $0x40] sm:$0xff] }
  0x12   :  { %167 = vmatpush1.msra.mxu0 %v125_v9  ;;  %545 = vmatpush1.msra.mxu1 %v125_v9  ;;  %v79_v52 = vld [vmem:[%s1007_s0 + $0x58] sm:$0xff]  ;;  %v102_v53 = vld [vmem:[%s1007_s0 + $0x110] sm:$0xff]  ;;  %v105_v54 = vld [vmem:[%s1007_s0 + $0x128] sm:$0xff] }
  0x13   :  { %168 = vmatprep.subr.mxu0 %v570_v0  ;;  %514 = vmatprep.subr.mxu1 %v570_v0  ;;  %v78_v55 = vld [vmem:[%s1007_s0 + $0x50] sm:$0xff]  ;;  %v81_v56 = vld [vmem:[%s1007_s0 + $0x68] sm:$0xff]  ;;  %v104_v57 = vld [vmem:[%s1007_s0 + $0x120] sm:$0xff] }
  0x14   :  { %169 = vmatpush1.msra.mxu0 %v124_v10  ;;  %546 = vmatpush1.msra.mxu1 %v124_v10  ;;  %v107_v58 = vld [vmem:[%s1007_s0 + $0x138] sm:$0xff]  ;;  %v80_v59 = vld [vmem:[%s1007_s0 + $0x60] sm:$0xff]  ;;  %v106_v61 = vld [vmem:[%s1007_s0 + $0x130] sm:$0xff] }
  0x15   :  { %170 = vmatprep.subr.mxu0 %v570_v0  ;;  %515 = vmatprep.subr.mxu1 %v570_v0  ;;  %v83_v60 = vld [vmem:[%s1007_s0 + $0x78] sm:$0xff]  ;;  %v109_v62 = vld [vmem:[%s1007_s0 + $0x148] sm:$0xff]  ;;  %v82_v63 = vld [vmem:[%s1007_s0 + $0x70] sm:$0xff] }
  0x16   :  { %171 = vmatpush1.msra.mxu0 %v123_v11  ;;  %547 = vmatpush1.msra.mxu1 %v123_v11  ;;  %v108_v1 = vld [vmem:[%s1007_s0 + $0x140] sm:$0xff]  ;;  %v111_v2 = vld [vmem:[%s1007_s0 + $0x158] sm:$0xff]  ;;  %v110_v5 = vld [vmem:[%s1007_s0 + $0x150] sm:$0xff] }
  0x17   :  { %172 = vmatprep.subr.mxu0 %v570_v0  ;;  %516 = vmatprep.subr.mxu1 %v570_v0  ;;  %v84_v3 = vld [vmem:[%s1007_s0 + $0x80] sm:$0xff]  ;;  %v87_v4 = vld [vmem:[%s1007_s0 + $0x98] sm:$0xff]  ;;  %v113_v6 = vld [vmem:[%s1007_s0 + $0x168] sm:$0xff] }
  0x18   :  { %173 = vmatpush1.msra.mxu0 %v122_v12  ;;  %548 = vmatpush1.msra.mxu1 %v122_v12  ;;  %v86_v7 = vld [vmem:[%s1007_s0 + $0x90] sm:$0xff]  ;;  %v89_v8 = vld [vmem:[%s1007_s0 + $0xa8] sm:$0xff]  ;;  %v112_v9 = vld [vmem:[%s1007_s0 + $0x160] sm:$0xff] }
  0x19   :  { %174 = vmatprep.subr.mxu0 %v570_v0  ;;  %517 = vmatprep.subr.mxu1 %v570_v0  ;;  %v115_v10 = vld [vmem:[%s1007_s0 + $0x178] sm:$0xff]  ;;  %v88_v11 = vld [vmem:[%s1007_s0 + $0xa0] sm:$0xff] }
  0x1a   :  { %175 = vmatpush1.msra.mxu0 %v121_v13  ;;  %549 = vmatpush1.msra.mxu1 %v121_v13  ;;  %v91_v12 = vld [vmem:[%s1007_s0 + $0xb8] sm:$0xff]  ;;  %v114_v13 = vld [vmem:[%s1007_s0 + $0x170] sm:$0xff] }
  0x1b   :  { %176 = vmatprep.subr.mxu0 %v570_v0  ;;  %518 = vmatprep.subr.mxu1 %v570_v0 }
  0x1c   :  { %177 = vmatpush1.msra.mxu0 %v120_v14  ;;  %550 = vmatpush1.msra.mxu1 %v120_v14  ;;  %v117_v14 = vld [vmem:[%s1007_s0 + $0x188] sm:$0xff] }
  0x1d   :  { %178 = vmatprep.subr.mxu0 %v570_v0  ;;  %519 = vmatprep.subr.mxu1 %v570_v0 }
  0x1e   :  { %179 = vmatpush1.msra.mxu0 %v119_v15  ;;  %551 = vmatpush1.msra.mxu1 %v119_v15  ;;  %v90_v15 = vld [vmem:[%s1007_s0 + $0xb0] sm:$0xff] }
  0x1f   :  { %180 = vmatprep.subr.mxu0 %v570_v0  ;;  %520 = vmatprep.subr.mxu1 %v570_v0 }
  0x20   :  { %181 = vmatpush1.msra.mxu0 %v118_v16  ;;  %552 = vmatpush1.msra.mxu1 %v118_v16  ;;  %v93_v16 = vld [vmem:[%s1007_s0 + $0xc8] sm:$0xff] }
  0x21   :  { %182 = vmatprep.subr.mxu0 %v570_v0  ;;  %521 = vmatprep.subr.mxu1 %v570_v0 }
  0x22   :  { %183 = vmatpush2.msra.mxu0 %v149_v17  ;;  %553 = vmatpush2.msra.mxu1 %v149_v17  ;;  %v116_v17 = vld [vmem:[%s1007_s0 + $0x180] sm:$0xff] }
  0x23   :  { %184 = vmatprep.subr.mxu0 %v570_v0  ;;  %522 = vmatprep.subr.mxu1 %v570_v0 }
  0x24   :  { %185 = vmatpush2.msra.mxu0 %v148_v18  ;;  %554 = vmatpush2.msra.mxu1 %v148_v18  ;;  %v92_v18 = vld [vmem:[%s1007_s0 + $0xc0] sm:$0xff] }
  0x25   :  { %186 = vmatprep.subr.mxu0 %v570_v0  ;;  %523 = vmatprep.subr.mxu1 %v570_v0 }
  0x26   :  { %187 = vmatpush2.msra.mxu0 %v147_v19  ;;  %555 = vmatpush2.msra.mxu1 %v147_v19  ;;  %v904_v19 = vld [vmem:[%s1008_s2] ss:$0 sm:$0xff] }
  0x27   :  { %188 = vmatprep.subr.mxu0 %v570_v0  ;;  %524 = vmatprep.subr.mxu1 %v570_v0 }
  0x28   :  { %189 = vmatpush2.msra.mxu0 %v146_v20  ;;  %556 = vmatpush2.msra.mxu1 %v146_v20 }
  0x29   :  { %190 = vmatprep.subr.mxu0 %v570_v0  ;;  %525 = vmatprep.subr.mxu1 %v570_v0 }
  0x2a   :  { %191 = vmatpush2.msra.mxu0 %v145_v21  ;;  %557 = vmatpush2.msra.mxu1 %v145_v21 }
  0x2b   :  { %192 = vmatprep.subr.mxu0 %v570_v0  ;;  %526 = vmatprep.subr.mxu1 %v570_v0 }
  0x2c   :  { %193 = vmatpush2.msra.mxu0 %v144_v22  ;;  %558 = vmatpush2.msra.mxu1 %v144_v22 }
  0x2d   :  { %194 = vmatprep.subr.mxu0 %v570_v0  ;;  %527 = vmatprep.subr.mxu1 %v570_v0 }
  0x2e   :  { %195 = vmatpush2.msra.mxu0 %v143_v23  ;;  %559 = vmatpush2.msra.mxu1 %v143_v23 }
  0x2f   :  { %196 = vmatprep.subr.mxu0 %v570_v0  ;;  %528 = vmatprep.subr.mxu1 %v570_v0 }
  0x30   :  { %197 = vmatpush2.msra.mxu0 %v142_v24  ;;  %560 = vmatpush2.msra.mxu1 %v142_v24 }
  0x31   :  { %198 = vmatprep.subr.mxu0 %v570_v0  ;;  %529 = vmatprep.subr.mxu1 %v570_v0 }
  0x32   :  { %199 = vmatpush2.msra.mxu0 %v141_v25  ;;  %561 = vmatpush2.msra.mxu1 %v141_v25 }
  0x33   :  { %200 = vmatprep.subr.mxu0 %v570_v0  ;;  %530 = vmatprep.subr.mxu1 %v570_v0 }
  0x34   :  { %201 = vmatpush2.msra.mxu0 %v140_v26  ;;  %562 = vmatpush2.msra.mxu1 %v140_v26 }
  0x35   :  { %202 = vmatprep.subr.mxu0 %v570_v0  ;;  %531 = vmatprep.subr.mxu1 %v570_v0 }
  0x36   :  { %203 = vmatpush2.msra.mxu0 %v139_v27  ;;  %563 = vmatpush2.msra.mxu1 %v139_v27 }
  0x37   :  { %204 = vmatprep.subr.mxu0 %v570_v0  ;;  %532 = vmatprep.subr.mxu1 %v570_v0 }
  0x38   :  { %205 = vmatpush2.msra.mxu0 %v138_v28  ;;  %564 = vmatpush2.msra.mxu1 %v138_v28 }
  0x39   :  { %206 = vmatprep.subr.mxu0 %v570_v0  ;;  %533 = vmatprep.subr.mxu1 %v570_v0 }
  0x3a   :  { %207 = vmatpush2.msra.mxu0 %v137_v29  ;;  %565 = vmatpush2.msra.mxu1 %v137_v29 }
  0x3b   :  { %208 = vmatprep.subr.mxu0 %v570_v0  ;;  %534 = vmatprep.subr.mxu1 %v570_v0 }
  0x3c   :  { %209 = vmatpush2.msra.mxu0 %v136_v30  ;;  %566 = vmatpush2.msra.mxu1 %v136_v30 }
  0x3d   :  { %210 = vmatprep.subr.mxu0 %v570_v0  ;;  %535 = vmatprep.subr.mxu1 %v570_v0 }
  0x3e   :  { %211 = vmatpush2.msra.mxu0 %v135_v31  ;;  %567 = vmatpush2.msra.mxu1 %v135_v31 }
  0x3f   :  { %212 = vmatprep.subr.mxu0 %v570_v0  ;;  %214 = vmatprep.mubr.f32.mxu0 %v69_v32 }
  0x40   :  { %213 = vmatpush2.msra.mxu0 %v134_v33  ;;  %536 = vmatprep.subr.mxu1 %v570_v0  ;;  %v85_v0 = vld [vmem:[%s1007_s0 + $0x88] sm:$0xff] }
  0x41   :  { %215 = vmatmul.mubr.f32.vlgmr.msra.gmra.mxu0 %v68_v34  ;;  %568 = vmatpush2.msra.mxu1 %v134_v33 }
  0x42   :  { %279 = vmatprep.mubr.f32.mxu1 %v95_v35  ;;  %219 = vmatprep.mubr.f32.mxu0 %v71_v36 }
  0x43   :  { %280 = vmatmul.mubr.f32.vlgmr.msra.gmra.mxu1 %v94_v37 }
  0x44   :  { %284 = vmatprep.mubr.f32.mxu1 %v97_v38 }
  0x45   :  { %220 = vmatmul.mubr.f32.gmra.mxu0 %v70_v39 }
  0x46   :  { %224 = vmatprep.mubr.f32.mxu0 %v73_v40 }
  0x47   :  { %285 = vmatmul.mubr.f32.gmra.mxu1 %v96_v41 }
  0x48   :  { %289 = vmatprep.mubr.f32.mxu1 %v99_v42 }
  0x49   :  { %225 = vmatmul.mubr.f32.gmra.mxu0 %v72_v43 }
  0x4a   :  { %229 = vmatprep.mubr.f32.mxu0 %v75_v44 }
  0x4b   :  { %290 = vmatmul.mubr.f32.gmra.mxu1 %v98_v45 }
  0x4c   :  { %294 = vmatprep.mubr.f32.mxu1 %v101_v46 }
  0x4d   :  { %230 = vmatmul.mubr.f32.gmra.mxu0 %v74_v47 }
  0x4e   :  { %234 = vmatprep.mubr.f32.mxu0 %v77_v48 }
  0x4f   :  { %295 = vmatmul.mubr.f32.gmra.mxu1 %v100_v49 }
  0x50   :  { %299 = vmatprep.mubr.f32.mxu1 %v103_v50 }
  0x51   :  { %235 = vmatmul.mubr.f32.gmra.mxu0 %v76_v51 }
  0x52   :  { %239 = vmatprep.mubr.f32.mxu0 %v79_v52 }
  0x53   :  { %300 = vmatmul.mubr.f32.gmra.mxu1 %v102_v53 }
  0x54   :  { %304 = vmatprep.mubr.f32.mxu1 %v105_v54 }
  0x55   :  { %240 = vmatmul.mubr.f32.gmra.mxu0 %v78_v55 }
  0x56   :  { %244 = vmatprep.mubr.f32.mxu0 %v81_v56 }
  0x57   :  { %305 = vmatmul.mubr.f32.gmra.mxu1 %v104_v57 }
  0x58   :  { %309 = vmatprep.mubr.f32.mxu1 %v107_v58 }
  0x59   :  { %245 = vmatmul.mubr.f32.gmra.mxu0 %v80_v59 }
  0x5a   :  { %249 = vmatprep.mubr.f32.mxu0 %v83_v60 }
  0x5b   :  { %310 = vmatmul.mubr.f32.gmra.mxu1 %v106_v61 }
  0x5c   :  { %314 = vmatprep.mubr.f32.mxu1 %v109_v62 }
  0x5d   :  { %250 = vmatmul.mubr.f32.gmra.mxu0 %v82_v63 }
  0x5e   :  { %254 = vmatprep.mubr.f32.mxu0 %v85_v0 }
  0x5f   :  { %315 = vmatmul.mubr.f32.gmra.mxu1 %v108_v1 }
  0x60   :  { %319 = vmatprep.mubr.f32.mxu1 %v111_v2 }
  0x61   :  { %255 = vmatmul.mubr.f32.gmra.mxu0 %v84_v3 }
  0x62   :  { %259 = vmatprep.mubr.f32.mxu0 %v87_v4 }
  0x63   :  { %320 = vmatmul.mubr.f32.gmra.mxu1 %v110_v5 }
  0x64   :  { %324 = vmatprep.mubr.f32.mxu1 %v113_v6 }
  0x65   :  { %260 = vmatmul.mubr.f32.gmra.mxu0 %v86_v7 }
  0x66   :  { %264 = vmatprep.mubr.f32.mxu0 %v89_v8 }
  0x67   :  { %325 = vmatmul.mubr.f32.gmra.mxu1 %v112_v9 }
  0x68   :  { %329 = vmatprep.mubr.f32.mxu1 %v115_v10 }
  0x69   :  { %265 = vmatmul.mubr.f32.gmra.mxu0 %v88_v11 }
  0x6a   :  { %269 = vmatprep.mubr.f32.mxu0 %v91_v12 }
  0x6b   :  { %330 = vmatmul.mubr.f32.gmra.mxu1 %v114_v13 }
  0x6c   :  { %334 = vmatprep.mubr.f32.mxu1 %v117_v14 }
  0x6d   :  { %270 = vmatmul.mubr.f32.gmra.mxu0 %v90_v15 }
  0x6e   :  { %274 = vmatprep.mubr.f32.mxu0 %v93_v16 }
  0x6f   :  { %335 = vmatmul.mubr.f32.gmra.mxu1 %v116_v17 }
  0x71   :  { %275 = vmatmul.mubr.f32.gmra.mxu0 %v92_v18 }
 0x101   :  { %v216_v20 = vpop.f32.mrf.mxu0 }
 0x102   :  { %v425_v21 = vadd.f32 %v904_v19, %v216_v20 }
 0x103   :  { %v218_v22 = vpop.f32.mrf.mxu0  ;;  %v281_v23 = vpop.f32.mrf.mxu1 }
 0x104   :  { %v450_v24 = vmax.f32 %v425_v21, 0.0  ;;  %v438_v25 = vadd.f32 %v904_v19, %v281_v23 }
 0x105   :  { %v221_v26 = vpop.f32.mrf.mxu0  ;;  %v283_v27 = vpop.f32.mrf.mxu1 }
 0x106   :  { %475 = vst [vmem:[%s1009_s3] sm:$0xff] %v450_v24  ;;  %v463_v28 = vmax.f32 %v438_v25, 0.0  ;;  %v426_v29 = vadd.f32 %v904_v19, %v221_v26 }
 0x107   :  { %v223_v30 = vpop.f32.mrf.mxu0  ;;  %v286_v31 = vpop.f32.mrf.mxu1 }
 0x108   :  { %488 = vst [vmem:[%s1009_s3 + $0x68] sm:$0xff] %v463_v28  ;;  %v451_v32 = vmax.f32 %v426_v29, 0.0  ;;  %v439_v33 = vadd.f32 %v904_v19, %v286_v31 }
 0x109   :  { %v226_v34 = vpop.f32.mrf.mxu0  ;;  %v288_v35 = vpop.f32.mrf.mxu1 }
 0x10a   :  { %476 = vst [vmem:[%s1009_s3 + $0x8] sm:$0xff] %v451_v32  ;;  %v464_v36 = vmax.f32 %v439_v33, 0.0  ;;  %v427_v37 = vadd.f32 %v904_v19, %v226_v34 }
 0x10b   :  { %v228_v38 = vpop.f32.mrf.mxu0  ;;  %v291_v39 = vpop.f32.mrf.mxu1 }
 0x10c   :  { %489 = vst [vmem:[%s1009_s3 + $0x70] sm:$0xff] %v464_v36  ;;  %v452_v40 = vmax.f32 %v427_v37, 0.0  ;;  %v440_v41 = vadd.f32 %v904_v19, %v291_v39 }
 0x10d   :  { %v231_v42 = vpop.f32.mrf.mxu0  ;;  %v293_v43 = vpop.f32.mrf.mxu1 }
 0x10e   :  { %477 = vst [vmem:[%s1009_s3 + $0x10] sm:$0xff] %v452_v40  ;;  %v465_v44 = vmax.f32 %v440_v41, 0.0  ;;  %v428_v45 = vadd.f32 %v904_v19, %v231_v42 }
 0x10f   :  { %v233_v46 = vpop.f32.mrf.mxu0  ;;  %v296_v47 = vpop.f32.mrf.mxu1 }
 0x110   :  { %490 = vst [vmem:[%s1009_s3 + $0x78] sm:$0xff] %v465_v44  ;;  %v453_v48 = vmax.f32 %v428_v45, 0.0  ;;  %v441_v49 = vadd.f32 %v904_v19, %v296_v47 }
 0x111   :  { %v236_v50 = vpop.f32.mrf.mxu0  ;;  %v298_v51 = vpop.f32.mrf.mxu1 }
 0x112   :  { %478 = vst [vmem:[%s1009_s3 + $0x18] sm:$0xff] %v453_v48  ;;  %v466_v52 = vmax.f32 %v441_v49, 0.0  ;;  %v429_v53 = vadd.f32 %v904_v19, %v236_v50 }
 0x113   :  { %v238_v54 = vpop.f32.mrf.mxu0  ;;  %v301_v55 = vpop.f32.mrf.mxu1 }
 0x114   :  { %491 = vst [vmem:[%s1009_s3 + $0x80] sm:$0xff] %v466_v52  ;;  %v454_v56 = vmax.f32 %v429_v53, 0.0  ;;  %v442_v57 = vadd.f32 %v904_v19, %v301_v55 }
 0x115   :  { %v241_v58 = vpop.f32.mrf.mxu0  ;;  %v303_v59 = vpop.f32.mrf.mxu1 }
 0x116   :  { %479 = vst [vmem:[%s1009_s3 + $0x20] sm:$0xff] %v454_v56  ;;  %v467_v60 = vmax.f32 %v442_v57, 0.0  ;;  %v430_v61 = vadd.f32 %v904_v19, %v241_v58 }
 0x117   :  { %v243_v62 = vpop.f32.mrf.mxu0  ;;  %v306_v63 = vpop.f32.mrf.mxu1 }
 0x118   :  { %492 = vst [vmem:[%s1009_s3 + $0x88] sm:$0xff] %v467_v60  ;;  %v455_v0 = vmax.f32 %v430_v61, 0.0  ;;  %v443_v1 = vadd.f32 %v904_v19, %v306_v63 }
 0x119   :  { %v246_v2 = vpop.f32.mrf.mxu0  ;;  %v308_v3 = vpop.f32.mrf.mxu1 }
 0x11a   :  { %480 = vst [vmem:[%s1009_s3 + $0x28] sm:$0xff] %v455_v0  ;;  %v468_v4 = vmax.f32 %v443_v1, 0.0  ;;  %v431_v5 = vadd.f32 %v904_v19, %v246_v2 }
 0x11b   :  { %v248_v6 = vpop.f32.mrf.mxu0  ;;  %v311_v7 = vpop.f32.mrf.mxu1 }
 0x11c   :  { %493 = vst [vmem:[%s1009_s3 + $0x90] sm:$0xff] %v468_v4  ;;  %v456_v8 = vmax.f32 %v431_v5, 0.0  ;;  %v444_v9 = vadd.f32 %v904_v19, %v311_v7 }
 0x11d   :  { %v251_v10 = vpop.f32.mrf.mxu0  ;;  %v313_v11 = vpop.f32.mrf.mxu1 }
 0x11e   :  { %481 = vst [vmem:[%s1009_s3 + $0x30] sm:$0xff] %v456_v8  ;;  %v469_v12 = vmax.f32 %v444_v9, 0.0  ;;  %v432_v13 = vadd.f32 %v904_v19, %v251_v10 }
 0x11f   :  { %v253_v14 = vpop.f32.mrf.mxu0  ;;  %v316_v15 = vpop.f32.mrf.mxu1 }
 0x120   :  { %494 = vst [vmem:[%s1009_s3 + $0x98] sm:$0xff] %v469_v12  ;;  %v457_v16 = vmax.f32 %v432_v13, 0.0  ;;  %v445_v17 = vadd.f32 %v904_v19, %v316_v15 }
 0x121   :  { %v256_v18 = vpop.f32.mrf.mxu0  ;;  %v318_v20 = vpop.f32.mrf.mxu1 }
 0x122   :  { %482 = vst [vmem:[%s1009_s3 + $0x38] sm:$0xff] %v457_v16  ;;  %v470_v21 = vmax.f32 %v445_v17, 0.0  ;;  %v433_v22 = vadd.f32 %v904_v19, %v256_v18 }
 0x123   :  { %v258_v23 = vpop.f32.mrf.mxu0  ;;  %v321_v24 = vpop.f32.mrf.mxu1 }
 0x124   :  { %495 = vst [vmem:[%s1009_s3 + $0xa0] sm:$0xff] %v470_v21  ;;  %v458_v25 = vmax.f32 %v433_v22, 0.0  ;;  %v446_v26 = vadd.f32 %v904_v19, %v321_v24 }
 0x125   :  { %v261_v27 = vpop.f32.mrf.mxu0  ;;  %v323_v28 = vpop.f32.mrf.mxu1 }
 0x126   :  { %483 = vst [vmem:[%s1009_s3 + $0x40] sm:$0xff] %v458_v25  ;;  %v471_v29 = vmax.f32 %v446_v26, 0.0  ;;  %v434_v30 = vadd.f32 %v904_v19, %v261_v27 }
 0x127   :  { %v263_v31 = vpop.f32.mrf.mxu0  ;;  %v326_v32 = vpop.f32.mrf.mxu1 }
 0x128   :  { %496 = vst [vmem:[%s1009_s3 + $0xa8] sm:$0xff] %v471_v29  ;;  %v459_v33 = vmax.f32 %v434_v30, 0.0  ;;  %v447_v34 = vadd.f32 %v904_v19, %v326_v32 }
 0x129   :  { %v266_v35 = vpop.f32.mrf.mxu0  ;;  %v328_v36 = vpop.f32.mrf.mxu1 }
 0x12a   :  { %484 = vst [vmem:[%s1009_s3 + $0x48] sm:$0xff] %v459_v33  ;;  %v472_v37 = vmax.f32 %v447_v34, 0.0  ;;  %v435_v38 = vadd.f32 %v904_v19, %v266_v35 }
 0x12b   :  { %v268_v39 = vpop.f32.mrf.mxu0  ;;  %v331_v40 = vpop.f32.mrf.mxu1 }
 0x12c   :  { %497 = vst [vmem:[%s1009_s3 + $0xb0] sm:$0xff] %v472_v37  ;;  %v460_v41 = vmax.f32 %v435_v38, 0.0  ;;  %v448_v42 = vadd.f32 %v904_v19, %v331_v40 }
 0x12d   :  { %v271_v43 = vpop.f32.mrf.mxu0  ;;  %v333_v44 = vpop.f32.mrf.mxu1 }
 0x12e   :  { %485 = vst [vmem:[%s1009_s3 + $0x50] sm:$0xff] %v460_v41  ;;  %v473_v45 = vmax.f32 %v448_v42, 0.0  ;;  %v436_v46 = vadd.f32 %v904_v19, %v271_v43 }
 0x12f   :  { %v273_v47 = vpop.f32.mrf.mxu0  ;;  %v336_v48 = vpop.f32.mrf.mxu1 }
 0x130   :  { %498 = vst [vmem:[%s1009_s3 + $0xb8] sm:$0xff] %v473_v45  ;;  %v461_v49 = vmax.f32 %v436_v46, 0.0  ;;  %v449_v50 = vadd.f32 %v904_v19, %v336_v48 }
 0x131   :  { %v276_v51 = vpop.f32.mrf.mxu0  ;;  %v338_v52 = vpop.f32.mrf.mxu1 }
 0x132   :  { %486 = vst [vmem:[%s1009_s3 + $0x58] sm:$0xff] %v461_v49  ;;  %v474_v53 = vmax.f32 %v449_v50, 0.0  ;;  %v437_v54 = vadd.f32 %v904_v19, %v276_v51 }
 0x133   :  { %v278_v55 = vpop.f32.mrf.mxu0 }
 0x134   :  { %499 = vst [vmem:[%s1009_s3 + $0xc0] sm:$0xff] %v474_v53  ;;  %v462_v56 = vmax.f32 %v437_v54, 0.0 }
 0x136   :  { %487 = vst [vmem:[%s1009_s3 + $0x60] sm:$0xff] %v462_v56 }

// kernel: squeeze.12
= control target key start
LH: loop header
LB: loop body
LE: loop exit
PB: predicated region body
PF: predicated region fallthrough
CT: control target
= control target key end

     0   :  { %vm3_vm0 = vcmask 130048   ;;  %s148_s0 = inlined_call_operand.vmem [shape: f32[2,5,5,16], index: 0, kind: input, shape index: {}]   ;;  %s149_s1 = inlined_call_operand.vmem [shape: f32[50,16], index: 1, kind: output, shape index: {}]  }
   0x1   :  { %v2_v0 = vld [vmem:[%s148_s0] sm:$0x1f]   ;;  %v50_v1 = vld [vmem:[%s148_s0 + $0x8] sm:$0x1f]   ;;  %v52_v2 = vld [vmem:[%s148_s0 + $0x10] sm:$0x1f]  }
   0x2   :  { %4 = vst.msk [vmem:[%s149_s1] sm:$0x1f] %vm3_vm0, %v2_v0   ;;  %51 = vst.msk [vmem:[%s149_s1 + $0x5] sm:$0x1f] %vm3_vm0, %v50_v1   ;;  %v54_v3 = vld [vmem:[%s148_s0 + $0x18] sm:$0x1f]  }
   0x3   :  { %53 = vst.msk [vmem:[%s149_s1 + $0xa] sm:$0x1f] %vm3_vm0, %v52_v2   ;;  %v56_v4 = vld [vmem:[%s148_s0 + $0x20] sm:$0x1f]   ;;  %v58_v5 = vld [vmem:[%s148_s0 + $0x28] sm:$0x1f]  }
   0x4   :  { %55 = vst.msk [vmem:[%s149_s1 + $0xf] sm:$0x1f] %vm3_vm0, %v54_v3   ;;  %57 = vst.msk [vmem:[%s149_s1 + $0x14] sm:$0x1f] %vm3_vm0, %v56_v4   ;;  %v60_v6 = vld [vmem:[%s148_s0 + $0x30] sm:$0x1f]  }
   0x5   :  { %59 = vst.msk [vmem:[%s149_s1 + $0x19] sm:$0x1f] %vm3_vm0, %v58_v5   ;;  %v62_v7 = vld [vmem:[%s148_s0 + $0x38] sm:$0x1f]   ;;  %v64_v8 = vld [vmem:[%s148_s0 + $0x40] sm:$0x1f]  }
   0x6   :  { %61 = vst.msk [vmem:[%s149_s1 + $0x1e] sm:$0x1f] %vm3_vm0, %v60_v6   ;;  %63 = vst.msk [vmem:[%s149_s1 + $0x23] sm:$0x1f] %vm3_vm0, %v62_v7   ;;  %v66_v9 = vld [vmem:[%s148_s0 + $0x48] sm:$0x1f]  }
   0x7   :  { %65 = vst.msk [vmem:[%s149_s1 + $0x28] sm:$0x1f] %vm3_vm0, %v64_v8   ;;  %67 = vst.msk [vmem:[%s149_s1 + $0x2d] sm:$0x1f] %vm3_vm0, %v66_v9  }

// kernel: convnet_forward.10
= control target key start
LH: loop header
LB: loop body
LE: loop exit
PB: predicated region body
PF: predicated region fallthrough
CT: control target
= control target key end

     0   :  { %s207_s0 = inlined_call_operand.vmem [shape: f32[56,128], index: 0, kind: input, shape index: {}]   ;;  %s208_s1 = inlined_call_operand.vmem [shape: f32[56,128], index: 1, kind: input, shape index: {}]   ;;  %s209_s2 = inlined_call_operand.vmem [shape: f32[56,128], index: 2, kind: input, shape index: {}]   ;;  %s210_s3 = inlined_call_operand.vmem [shape: f32[56,128], index: 3, kind: input, shape index: {}]   ;;  %s211_s4 = inlined_call_operand.vmem [shape: f32[56,128], index: 4, kind: output, shape index: {}]  }
   0x1   :  { %v17_v0 = vld [vmem:[%s207_s0] sm:$0xff]  ;;  %v18_v5 = vld [vmem:[%s207_s0 + $0x8] sm:$0xff]  ;;  %v19_v11 = vld [vmem:[%s207_s0 + $0x10] sm:$0xff] }
   0x2   :  { %v24_v1 = vld [vmem:[%s208_s1] sm:$0xff]  ;;  %v25_v6 = vld [vmem:[%s208_s1 + $0x8] sm:$0xff]  ;;  %v26_v13 = vld [vmem:[%s208_s1 + $0x10] sm:$0xff] }
   0x3   :  { %v38_v2 = vld [vmem:[%s209_s2] sm:$0xff]  ;;  %v31_v3 = vmax.f32 %v17_v0, %v24_v1  ;;  %v32_v8 = vmax.f32 %v18_v5, %v25_v6  ;;  %v39_v9 = vld [vmem:[%s209_s2 + $0x8] sm:$0xff]  ;;  %v40_v14 = vld [vmem:[%s209_s2 + $0x10] sm:$0xff]  ;;  %v33_v17 = vmax.f32 %v19_v11, %v26_v13 }
   0x4   :  { %v45_v4 = vld [vmem:[%s210_s3] sm:$0xff]  ;;  %v46_v10 = vld [vmem:[%s210_s3 + $0x8] sm:$0xff]  ;;  %v47_v15 = vld [vmem:[%s210_s3 + $0x10] sm:$0xff] }
   0x5   :  { %v52_v7 = vmax.f32 %v38_v2, %v45_v4  ;;  %v53_v12 = vmax.f32 %v39_v9, %v46_v10  ;;  %v54_v18 = vmax.f32 %v40_v14, %v47_v15  ;;  %v20_v19 = vld [vmem:[%s207_s0 + $0x18] sm:$0xff]  ;;  %v21_v25 = vld [vmem:[%s207_s0 + $0x20] sm:$0xff]  ;;  %v22_v32 = vld [vmem:[%s207_s0 + $0x28] sm:$0xff] }
   0x6   :  { %v27_v20 = vld [vmem:[%s208_s1 + $0x18] sm:$0xff]  ;;  %v28_v26 = vld [vmem:[%s208_s1 + $0x20] sm:$0xff]  ;;  %v29_v34 = vld [vmem:[%s208_s1 + $0x28] sm:$0xff] }
   0x7   :  { %v59_v16 = vmax.f32 %v31_v3, %v52_v7  ;;  %v41_v21 = vld [vmem:[%s209_s2 + $0x18] sm:$0xff]  ;;  %v60_v22 = vmax.f32 %v32_v8, %v53_v12  ;;  %v34_v23 = vmax.f32 %v20_v19, %v27_v20  ;;  %v61_v27 = vmax.f32 %v33_v17, %v54_v18  ;;  %v42_v30 = vld [vmem:[%s209_s2 + $0x20] sm:$0xff]  ;;  %v43_v35 = vld [vmem:[%s209_s2 + $0x28] sm:$0xff] }
   0x8   :  { %v48_v24 = vld [vmem:[%s210_s3 + $0x18] sm:$0xff]  ;;  %v35_v29 = vmax.f32 %v21_v25, %v28_v26  ;;  %v49_v31 = vld [vmem:[%s210_s3 + $0x20] sm:$0xff]  ;;  %v50_v36 = vld [vmem:[%s210_s3 + $0x28] sm:$0xff]  ;;  %v36_v38 = vmax.f32 %v22_v32, %v29_v34 }
   0x9   :  { %66 = vst [vmem:[%s211_s4] sm:$0xff] %v59_v16  ;;  %v55_v28 = vmax.f32 %v41_v21, %v48_v24  ;;  %67 = vst [vmem:[%s211_s4 + $0x8] sm:$0xff] %v60_v22  ;;  %v56_v33 = vmax.f32 %v42_v30, %v49_v31  ;;  %v57_v39 = vmax.f32 %v43_v35, %v50_v36  ;;  %v23_v40 = vld [vmem:[%s207_s0 + $0x30] sm:$0xff] }
   0xa   :  { %68 = vst [vmem:[%s211_s4 + $0x10] sm:$0xff] %v61_v27  ;;  %v30_v41 = vld [vmem:[%s208_s1 + $0x30] sm:$0xff] }
   0xb   :  { %v62_v37 = vmax.f32 %v34_v23, %v55_v28  ;;  %v44_v42 = vld [vmem:[%s209_s2 + $0x30] sm:$0xff]  ;;  %v63_v43 = vmax.f32 %v35_v29, %v56_v33  ;;  %v37_v44 = vmax.f32 %v23_v40, %v30_v41  ;;  %v64_v46 = vmax.f32 %v36_v38, %v57_v39 }
   0xc   :  { %v51_v45 = vld [vmem:[%s210_s3 + $0x30] sm:$0xff] }
   0xd   :  { %69 = vst [vmem:[%s211_s4 + $0x18] sm:$0xff] %v62_v37  ;;  %v58_v47 = vmax.f32 %v44_v42, %v51_v45  ;;  %70 = vst [vmem:[%s211_s4 + $0x20] sm:$0xff] %v63_v43 }
   0xe   :  { %71 = vst [vmem:[%s211_s4 + $0x28] sm:$0xff] %v64_v46 }
   0xf   :  { %v65_v48 = vmax.f32 %v37_v44, %v58_v47 }
  0x11   :  { %72 = vst [vmem:[%s211_s4 + $0x30] sm:$0xff] %v65_v48 }

// kernel: convnet_forward.11
= control target key start
LH: loop header
LB: loop body
LE: loop exit
PB: predicated region body
PF: predicated region fallthrough
CT: control target
= control target key end

     0   :  { %s549_s1 = inlined_call_operand.vmem [shape: f32[512,128], index: 1, kind: input, shape index: {}]   ;;  %s550_s0 = inlined_call_operand.vmem [shape: f32[8,512], index: 0, kind: input, shape index: {}]   ;;  %s551_s2 = inlined_call_operand.vmem [shape: f32[1,128], index: 2, kind: input, shape index: {}]   ;;  %s552_s3 = inlined_call_operand.vmem [shape: f32[8,128], index: 3, kind: output, shape index: {}]  }
   0x1   :  { %v55_v0 = vld [vmem:[%s549_s1 + $0xf8] sm:$0xff]  ;;  %v54_v4 = vld [vmem:[%s549_s1 + $0xf0] sm:$0xff]  ;;  %v53_v8 = vld [vmem:[%s549_s1 + $0xe8] sm:$0xff] }
   0x2   :  { %v87_v1 = vld [vmem:[%s549_s1 + $0x1f8] sm:$0xff]  ;;  %249 = vmatprep.subr.mxu0 %v55_v0  ;;  %v86_v5 = vld [vmem:[%s549_s1 + $0x1f0] sm:$0xff]  ;;  %v85_v9 = vld [vmem:[%s549_s1 + $0x1e8] sm:$0xff] }
   0x3   :  { %v39_v2 = vld [vmem:[%s549_s1 + $0x78] sm:$0xff]  ;;  %284 = vmatprep.subr.mxu1 %v87_v1  ;;  %v38_v6 = vld [vmem:[%s549_s1 + $0x70] sm:$0xff]  ;;  %v37_v10 = vld [vmem:[%s549_s1 + $0x68] sm:$0xff] }
   0x4   :  { %v71_v3 = vld [vmem:[%s549_s1 + $0x178] sm:$0xff]  ;;  %250 = vmatpush3.msra.mxu0 %v39_v2  ;;  %v70_v7 = vld [vmem:[%s549_s1 + $0x170] sm:$0xff]  ;;  %v69_v11 = vld [vmem:[%s549_s1 + $0x168] sm:$0xff] }
   0x5   :  { %285 = vmatpush3.msra.mxu1 %v71_v3  ;;  %251 = vmatprep.subr.mxu0 %v54_v4  ;;  %v52_v12 = vld [vmem:[%s549_s1 + $0xe0] sm:$0xff]  ;;  %v51_v16 = vld [vmem:[%s549_s1 + $0xd8] sm:$0xff]  ;;  %v50_v20 = vld [vmem:[%s549_s1 + $0xd0] sm:$0xff] }
   0x6   :  { %286 = vmatprep.subr.mxu1 %v86_v5  ;;  %252 = vmatpush3.msra.mxu0 %v38_v6  ;;  %v84_v13 = vld [vmem:[%s549_s1 + $0x1e0] sm:$0xff]  ;;  %v83_v17 = vld [vmem:[%s549_s1 + $0x1d8] sm:$0xff]  ;;  %v82_v21 = vld [vmem:[%s549_s1 + $0x1d0] sm:$0xff] }
   0x7   :  { %287 = vmatpush3.msra.mxu1 %v70_v7  ;;  %253 = vmatprep.subr.mxu0 %v53_v8  ;;  %v36_v14 = vld [vmem:[%s549_s1 + $0x60] sm:$0xff]  ;;  %v35_v18 = vld [vmem:[%s549_s1 + $0x58] sm:$0xff]  ;;  %v34_v22 = vld [vmem:[%s549_s1 + $0x50] sm:$0xff] }
   0x8   :  { %288 = vmatprep.subr.mxu1 %v85_v9  ;;  %v68_v15 = vld [vmem:[%s549_s1 + $0x160] sm:$0xff]  ;;  %254 = vmatpush3.msra.mxu0 %v37_v10  ;;  %v67_v19 = vld [vmem:[%s549_s1 + $0x158] sm:$0xff]  ;;  %v66_v23 = vld [vmem:[%s549_s1 + $0x150] sm:$0xff] }
   0x9   :  { %289 = vmatpush3.msra.mxu1 %v69_v11  ;;  %255 = vmatprep.subr.mxu0 %v52_v12  ;;  %v49_v24 = vld [vmem:[%s549_s1 + $0xc8] sm:$0xff]  ;;  %v48_v28 = vld [vmem:[%s549_s1 + $0xc0] sm:$0xff]  ;;  %v47_v32 = vld [vmem:[%s549_s1 + $0xb8] sm:$0xff] }
   0xa   :  { %290 = vmatprep.subr.mxu1 %v84_v13  ;;  %256 = vmatpush3.msra.mxu0 %v36_v14  ;;  %v81_v25 = vld [vmem:[%s549_s1 + $0x1c8] sm:$0xff]  ;;  %v80_v29 = vld [vmem:[%s549_s1 + $0x1c0] sm:$0xff]  ;;  %v79_v33 = vld [vmem:[%s549_s1 + $0x1b8] sm:$0xff] }
   0xb   :  { %291 = vmatpush3.msra.mxu1 %v68_v15  ;;  %257 = vmatprep.subr.mxu0 %v51_v16  ;;  %v33_v26 = vld [vmem:[%s549_s1 + $0x48] sm:$0xff]  ;;  %v32_v30 = vld [vmem:[%s549_s1 + $0x40] sm:$0xff]  ;;  %v31_v34 = vld [vmem:[%s549_s1 + $0x38] sm:$0xff] }
   0xc   :  { %292 = vmatprep.subr.mxu1 %v83_v17  ;;  %258 = vmatpush3.msra.mxu0 %v35_v18  ;;  %v65_v27 = vld [vmem:[%s549_s1 + $0x148] sm:$0xff]  ;;  %v64_v31 = vld [vmem:[%s549_s1 + $0x140] sm:$0xff]  ;;  %v63_v35 = vld [vmem:[%s549_s1 + $0x138] sm:$0xff] }
   0xd   :  { %293 = vmatpush3.msra.mxu1 %v67_v19  ;;  %259 = vmatprep.subr.mxu0 %v50_v20  ;;  %v46_v36 = vld [vmem:[%s549_s1 + $0xb0] sm:$0xff]  ;;  %v45_v40 = vld [vmem:[%s549_s1 + $0xa8] sm:$0xff]  ;;  %v44_v44 = vld [vmem:[%s549_s1 + $0xa0] sm:$0xff] }
   0xe   :  { %294 = vmatprep.subr.mxu1 %v82_v21  ;;  %260 = vmatpush3.msra.mxu0 %v34_v22  ;;  %v78_v37 = vld [vmem:[%s549_s1 + $0x1b0] sm:$0xff]  ;;  %v77_v41 = vld [vmem:[%s549_s1 + $0x1a8] sm:$0xff]  ;;  %v76_v45 = vld [vmem:[%s549_s1 + $0x1a0] sm:$0xff] }
   0xf   :  { %295 = vmatpush3.msra.mxu1 %v66_v23  ;;  %261 = vmatprep.subr.mxu0 %v49_v24  ;;  %v30_v38 = vld [vmem:[%s549_s1 + $0x30] sm:$0xff]  ;;  %v29_v42 = vld [vmem:[%s549_s1 + $0x28] sm:$0xff]  ;;  %v28_v46 = vld [vmem:[%s549_s1 + $0x20] sm:$0xff] }
  0x10   :  { %296 = vmatprep.subr.mxu1 %v81_v25  ;;  %262 = vmatpush3.msra.mxu0 %v33_v26  ;;  %v62_v39 = vld [vmem:[%s549_s1 + $0x130] sm:$0xff]  ;;  %v61_v43 = vld [vmem:[%s549_s1 + $0x128] sm:$0xff]  ;;  %v60_v47 = vld [vmem:[%s549_s1 + $0x120] sm:$0xff] }
  0x11   :  { %297 = vmatpush3.msra.mxu1 %v65_v27  ;;  %263 = vmatprep.subr.mxu0 %v48_v28  ;;  %v43_v48 = vld [vmem:[%s549_s1 + $0x98] sm:$0xff]  ;;  %v42_v52 = vld [vmem:[%s549_s1 + $0x90] sm:$0xff]  ;;  %v41_v56 = vld [vmem:[%s549_s1 + $0x88] sm:$0xff] }
  0x12   :  { %298 = vmatprep.subr.mxu1 %v80_v29  ;;  %264 = vmatpush3.msra.mxu0 %v32_v30  ;;  %v75_v49 = vld [vmem:[%s549_s1 + $0x198] sm:$0xff]  ;;  %v74_v53 = vld [vmem:[%s549_s1 + $0x190] sm:$0xff]  ;;  %v73_v57 = vld [vmem:[%s549_s1 + $0x188] sm:$0xff] }
  0x13   :  { %299 = vmatpush3.msra.mxu1 %v64_v31  ;;  %265 = vmatprep.subr.mxu0 %v47_v32  ;;  %v27_v50 = vld [vmem:[%s549_s1 + $0x18] sm:$0xff]  ;;  %v26_v54 = vld [vmem:[%s549_s1 + $0x10] sm:$0xff]  ;;  %v25_v58 = vld [vmem:[%s549_s1 + $0x8] sm:$0xff] }
  0x14   :  { %300 = vmatprep.subr.mxu1 %v79_v33  ;;  %266 = vmatpush3.msra.mxu0 %v31_v34  ;;  %v59_v51 = vld [vmem:[%s549_s1 + $0x118] sm:$0xff]  ;;  %v58_v55 = vld [vmem:[%s549_s1 + $0x110] sm:$0xff]  ;;  %v57_v59 = vld [vmem:[%s549_s1 + $0x108] sm:$0xff] }
  0x15   :  { %301 = vmatpush3.msra.mxu1 %v63_v35  ;;  %267 = vmatprep.subr.mxu0 %v46_v36  ;;  %v40_v60 = vld [vmem:[%s549_s1 + $0x80] sm:$0xff]  ;;  %v21_v63 = vld [vmem:[%s550_s0 + $0x8] sm:$0xff]  ;;  %v23_v1 = vld [vmem:[%s550_s0 + $0x18] sm:$0xff] }
  0x16   :  { %302 = vmatprep.subr.mxu1 %v78_v37  ;;  %268 = vmatpush3.msra.mxu0 %v30_v38  ;;  %v72_v61 = vld [vmem:[%s549_s1 + $0x180] sm:$0xff]  ;;  %v22_v3 = vld [vmem:[%s550_s0 + $0x10] sm:$0xff] }
  0x17   :  { %303 = vmatpush3.msra.mxu1 %v62_v39  ;;  %269 = vmatprep.subr.mxu0 %v45_v40  ;;  %v24_v62 = vld [vmem:[%s549_s1] sm:$0xff] }
  0x18   :  { %304 = vmatprep.subr.mxu1 %v77_v41  ;;  %270 = vmatpush3.msra.mxu0 %v29_v42  ;;  %v56_v0 = vld [vmem:[%s549_s1 + $0x100] sm:$0xff] }
  0x19   :  { %305 = vmatpush3.msra.mxu1 %v61_v43  ;;  %271 = vmatprep.subr.mxu0 %v44_v44  ;;  %v20_v2 = vld [vmem:[%s550_s0] sm:$0xff] }
  0x1a   :  { %306 = vmatprep.subr.mxu1 %v76_v45  ;;  %272 = vmatpush3.msra.mxu0 %v28_v46  ;;  %v248_v10 = vld [vmem:[%s551_s2] ss:$0 sm:$0xff] }
  0x1b   :  { %307 = vmatpush3.msra.mxu1 %v60_v47  ;;  %273 = vmatprep.subr.mxu0 %v43_v48 }
  0x1c   :  { %308 = vmatprep.subr.mxu1 %v75_v49  ;;  %274 = vmatpush3.msra.mxu0 %v27_v50 }
  0x1d   :  { %309 = vmatpush3.msra.mxu1 %v59_v51  ;;  %275 = vmatprep.subr.mxu0 %v42_v52 }
  0x1e   :  { %310 = vmatprep.subr.mxu1 %v74_v53  ;;  %276 = vmatpush3.msra.mxu0 %v26_v54 }
  0x1f   :  { %311 = vmatpush3.msra.mxu1 %v58_v55  ;;  %277 = vmatprep.subr.mxu0 %v41_v56 }
  0x20   :  { %312 = vmatprep.subr.mxu1 %v73_v57  ;;  %278 = vmatpush3.msra.mxu0 %v25_v58 }
  0x21   :  { %313 = vmatpush3.msra.mxu1 %v57_v59  ;;  %279 = vmatprep.subr.mxu0 %v40_v60 }
  0x22   :  { %314 = vmatprep.subr.mxu1 %v72_v61  ;;  %280 = vmatpush3.msra.mxu0 %v24_v62 }
  0x23   :  { %152 = vmatprep.mubr.f32.mxu0 %v21_v63  ;;  %315 = vmatpush3.msra.mxu1 %v56_v0 }
  0x24   :  { %222 = vmatprep.mubr.f32.mxu1 %v23_v1  ;;  %153 = vmatmul.mubr.f32.vlgmr.msra.gmra.mxu0 %v20_v2 }
  0x25   :  { %223 = vmatmul.mubr.f32.vlgmr.msra.gmra.mxu1 %v22_v3 }
  0xe4   :  { %v281_v4 = vpop.f32.mrf.mxu0 }
  0xe5   :  { %v316_v5 = vpop.f32.mrf.mxu1 }
  0xe6   :  { %v282_v6 = vpop.f32.mrf.mxu0 }
  0xe7   :  { %v317_v7 = vpop.f32.mrf.mxu1  ;;  %v283_v8 = vadd.f32 %v282_v6, %v281_v4 }
  0xe8   :  { %v318_v9 = vadd.f32 %v317_v7, %v316_v5 }
  0xea   :  { %v225_v11 = vadd.f32 %v318_v9, %v283_v8 }
  0xec   :  { %v241_v12 = vadd.f32 %v248_v10, %v225_v11 }
  0xee   :  { %v242_v13 = vmax.f32 %v241_v12, 0.0 }
  0xf0   :  { %243 = vst [vmem:[%s552_s3] sm:$0xff] %v242_v13 }

// kernel: convnet_forward.12
= control target key start
LH: loop header
LB: loop body
LE: loop exit
PB: predicated region body
PF: predicated region fallthrough
CT: control target
= control target key end

     0   :  { %v182_v0 = vmov 0.0   ;;  %vm183_vm0 = vmmov 0   ;;  %s261_s1 = inlined_call_operand.vmem [shape: f32[128,128], index: 1, kind: input, shape index: {}]   ;;  %s262_s0 = inlined_call_operand.vmem [shape: f32[8,128], index: 0, kind: input, shape index: {}]   ;;  %s263_s2 = inlined_call_operand.vmem [shape: f32[1,128], index: 2, kind: input, shape index: {}]   ;;  %s264_s3 = inlined_call_operand.vmem [shape: f32[8,128], index: 3, kind: output, shape index: {}]  }
   0x1   :  { %145 = vmatprep.subr.mxu0 %v182_v0  ;;  %v36_v1 = vld [vmem:[%s261_s1 + $0x78] sm:$0xff]  ;;  %v35_v2 = vld [vmem:[%s261_s1 + $0x70] sm:$0xff]  ;;  %177 = vmatprep.mubr.msk.f32.mxu0 %vm183_vm0, %v182_v0  ;;  %v34_v3 = vld [vmem:[%s261_s1 + $0x68] sm:$0xff] }
   0x2   :  { %146 = vmatpush3.msra.mxu0 %v36_v1  ;;  %v33_v4 = vld [vmem:[%s261_s1 + $0x60] sm:$0xff]  ;;  %v32_v5 = vld [vmem:[%s261_s1 + $0x58] sm:$0xff]  ;;  %v31_v6 = vld [vmem:[%s261_s1 + $0x50] sm:$0xff] }
   0x3   :  { %147 = vmatprep.subr.mxu0 %v182_v0  ;;  %v30_v7 = vld [vmem:[%s261_s1 + $0x48] sm:$0xff]  ;;  %v29_v8 = vld [vmem:[%s261_s1 + $0x40] sm:$0xff]  ;;  %v28_v9 = vld [vmem:[%s261_s1 + $0x38] sm:$0xff] }
   0x4   :  { %148 = vmatpush3.msra.mxu0 %v35_v2  ;;  %v27_v10 = vld [vmem:[%s261_s1 + $0x30] sm:$0xff]  ;;  %v26_v11 = vld [vmem:[%s261_s1 + $0x28] sm:$0xff]  ;;  %v25_v12 = vld [vmem:[%s261_s1 + $0x20] sm:$0xff] }
   0x5   :  { %149 = vmatprep.subr.mxu0 %v182_v0  ;;  %v24_v13 = vld [vmem:[%s261_s1 + $0x18] sm:$0xff]  ;;  %v23_v14 = vld [vmem:[%s261_s1 + $0x10] sm:$0xff]  ;;  %v22_v15 = vld [vmem:[%s261_s1 + $0x8] sm:$0xff] }
   0x6   :  { %150 = vmatpush3.msra.mxu0 %v34_v3  ;;  %v21_v16 = vld [vmem:[%s261_s1] sm:$0xff] }
   0x7   :  { %151 = vmatprep.subr.mxu0 %v182_v0  ;;  %v20_v17 = vld [vmem:[%s262_s0] sm:$0xff] }
   0x8   :  { %152 = vmatpush3.msra.mxu0 %v33_v4  ;;  %v127_v18 = vld [vmem:[%s263_s2] ss:$0 sm:$0xff] }
   0x9   :  { %153 = vmatprep.subr.mxu0 %v182_v0 }
   0xa   :  { %154 = vmatpush3.msra.mxu0 %v32_v5 }
   0xb   :  { %155 = vmatprep.subr.mxu0 %v182_v0 }
   0xc   :  { %156 = vmatpush3.msra.mxu0 %v31_v6 }
   0xd   :  { %157 = vmatprep.subr.mxu0 %v182_v0 }
   0xe   :  { %158 = vmatpush3.msra.mxu0 %v30_v7 }
   0xf   :  { %159 = vmatprep.subr.mxu0 %v182_v0 }
  0x10   :  { %160 = vmatpush3.msra.mxu0 %v29_v8 }
  0x11   :  { %161 = vmatprep.subr.mxu0 %v182_v0 }
  0x12   :  { %162 = vmatpush3.msra.mxu0 %v28_v9 }
  0x13   :  { %163 = vmatprep.subr.mxu0 %v182_v0 }
  0x14   :  { %164 = vmatpush3.msra.mxu0 %v27_v10 }
  0x15   :  { %165 = vmatprep.subr.mxu0 %v182_v0 }
  0x16   :  { %166 = vmatpush3.msra.mxu0 %v26_v11 }
  0x17   :  { %167 = vmatprep.subr.mxu0 %v182_v0 }
  0x18   :  { %168 = vmatpush3.msra.mxu0 %v25_v12 }
  0x19   :  { %169 = vmatprep.subr.mxu0 %v182_v0 }
  0x1a   :  { %170 = vmatpush3.msra.mxu0 %v24_v13 }
  0x1b   :  { %171 = vmatprep.subr.mxu0 %v182_v0 }
  0x1c   :  { %172 = vmatpush3.msra.mxu0 %v23_v14 }
  0x1d   :  { %173 = vmatprep.subr.mxu0 %v182_v0 }
  0x1e   :  { %174 = vmatpush3.msra.mxu0 %v22_v15 }
  0x1f   :  { %175 = vmatprep.subr.mxu0 %v182_v0 }
  0x20   :  { %176 = vmatpush3.msra.mxu0 %v21_v16 }
  0x21   :  { %178 = vmatmul.mubr.f32.vlgmr.msra.gmra.mxu0 %v20_v17 }
  0xe1   :  { %v103_v19 = vpop.f32.mrf.mxu0 }
  0xe2   :  { %v120_v20 = vadd.f32 %v127_v18, %v103_v19 }
  0xe3   :  { %v179_v21 = vpop.f32.mrf.mxu0 }
  0xe4   :  { %v121_v22 = vmax.f32 %v120_v20, 0.0 }
  0xe6   :  { %122 = vst [vmem:[%s264_s3] sm:$0xff] %v121_v22 }

// kernel: convnet_forward.13
= control target key start
LH: loop header
LB: loop body
LE: loop exit
PB: predicated region body
PF: predicated region fallthrough
CT: control target
= control target key end

     0   :  { %v181_v0 = vmov 0.0   ;;  %vm182_vm0 = vmmov 0   ;;  %s260_s1 = inlined_call_operand.vmem [shape: f32[128,128], index: 1, kind: input, shape index: {}]   ;;  %s261_s0 = inlined_call_operand.vmem [shape: f32[8,128], index: 0, kind: input, shape index: {}]   ;;  %s262_s2 = inlined_call_operand.vmem [shape: f32[1,128], index: 2, kind: input, shape index: {}]   ;;  %s263_s3 = inlined_call_operand.vmem [shape: f32[8,128], index: 3, kind: output, shape index: {}]  }
   0x1   :  { %144 = vmatprep.subr.mxu0 %v181_v0  ;;  %v36_v1 = vld [vmem:[%s260_s1 + $0x78] sm:$0xff]  ;;  %v35_v2 = vld [vmem:[%s260_s1 + $0x70] sm:$0xff]  ;;  %176 = vmatprep.mubr.msk.f32.mxu0 %vm182_vm0, %v181_v0  ;;  %v34_v3 = vld [vmem:[%s260_s1 + $0x68] sm:$0xff] }
   0x2   :  { %145 = vmatpush3.msra.mxu0 %v36_v1  ;;  %v33_v4 = vld [vmem:[%s260_s1 + $0x60] sm:$0xff]  ;;  %v32_v5 = vld [vmem:[%s260_s1 + $0x58] sm:$0xff]  ;;  %v31_v6 = vld [vmem:[%s260_s1 + $0x50] sm:$0xff] }
   0x3   :  { %146 = vmatprep.subr.mxu0 %v181_v0  ;;  %v30_v7 = vld [vmem:[%s260_s1 + $0x48] sm:$0xff]  ;;  %v29_v8 = vld [vmem:[%s260_s1 + $0x40] sm:$0xff]  ;;  %v28_v9 = vld [vmem:[%s260_s1 + $0x38] sm:$0xff] }
   0x4   :  { %147 = vmatpush3.msra.mxu0 %v35_v2  ;;  %v27_v10 = vld [vmem:[%s260_s1 + $0x30] sm:$0xff]  ;;  %v26_v11 = vld [vmem:[%s260_s1 + $0x28] sm:$0xff]  ;;  %v25_v12 = vld [vmem:[%s260_s1 + $0x20] sm:$0xff] }
   0x5   :  { %148 = vmatprep.subr.mxu0 %v181_v0  ;;  %v24_v13 = vld [vmem:[%s260_s1 + $0x18] sm:$0xff]  ;;  %v23_v14 = vld [vmem:[%s260_s1 + $0x10] sm:$0xff]  ;;  %v22_v15 = vld [vmem:[%s260_s1 + $0x8] sm:$0xff] }
   0x6   :  { %149 = vmatpush3.msra.mxu0 %v34_v3  ;;  %v21_v16 = vld [vmem:[%s260_s1] sm:$0xff] }
   0x7   :  { %150 = vmatprep.subr.mxu0 %v181_v0  ;;  %v20_v17 = vld [vmem:[%s261_s0] sm:$0xff] }
   0x8   :  { %151 = vmatpush3.msra.mxu0 %v33_v4  ;;  %v126_v18 = vld [vmem:[%s262_s2] ss:$0 sm:$0xff] }
   0x9   :  { %152 = vmatprep.subr.mxu0 %v181_v0 }
   0xa   :  { %153 = vmatpush3.msra.mxu0 %v32_v5 }
   0xb   :  { %154 = vmatprep.subr.mxu0 %v181_v0 }
   0xc   :  { %155 = vmatpush3.msra.mxu0 %v31_v6 }
   0xd   :  { %156 = vmatprep.subr.mxu0 %v181_v0 }
   0xe   :  { %157 = vmatpush3.msra.mxu0 %v30_v7 }
   0xf   :  { %158 = vmatprep.subr.mxu0 %v181_v0 }
  0x10   :  { %159 = vmatpush3.msra.mxu0 %v29_v8 }
  0x11   :  { %160 = vmatprep.subr.mxu0 %v181_v0 }
  0x12   :  { %161 = vmatpush3.msra.mxu0 %v28_v9 }
  0x13   :  { %162 = vmatprep.subr.mxu0 %v181_v0 }
  0x14   :  { %163 = vmatpush3.msra.mxu0 %v27_v10 }
  0x15   :  { %164 = vmatprep.subr.mxu0 %v181_v0 }
  0x16   :  { %165 = vmatpush3.msra.mxu0 %v26_v11 }
  0x17   :  { %166 = vmatprep.subr.mxu0 %v181_v0 }
  0x18   :  { %167 = vmatpush3.msra.mxu0 %v25_v12 }
  0x19   :  { %168 = vmatprep.subr.mxu0 %v181_v0 }
  0x1a   :  { %169 = vmatpush3.msra.mxu0 %v24_v13 }
  0x1b   :  { %170 = vmatprep.subr.mxu0 %v181_v0 }
  0x1c   :  { %171 = vmatpush3.msra.mxu0 %v23_v14 }
  0x1d   :  { %172 = vmatprep.subr.mxu0 %v181_v0 }
  0x1e   :  { %173 = vmatpush3.msra.mxu0 %v22_v15 }
  0x1f   :  { %174 = vmatprep.subr.mxu0 %v181_v0 }
  0x20   :  { %175 = vmatpush3.msra.mxu0 %v21_v16 }
  0x21   :  { %177 = vmatmul.mubr.f32.vlgmr.msra.gmra.mxu0 %v20_v17 }
  0xe1   :  { %v103_v19 = vpop.f32.mrf.mxu0 }
  0xe2   :  { %v120_v20 = vadd.f32 %v126_v18, %v103_v19 }
  0xe3   :  { %v178_v21 = vpop.f32.mrf.mxu0 }
  0xe4   :  { %121 = vst [vmem:[%s263_s3] sm:$0xff] %v120_v20 }

</bundles_post_ra>
